<compile_context>
chip_gen: v7x
topology: tpu7x:2x2x1
jax: 0.10.0
libtpu: 0.0.40
codegen_flags: <defaults>
</compile_context>

<pallas_src>
import functools

import jax
import jax.numpy as jnp
from jax.experimental import pallas as pl
from jax.experimental.pallas import tpu as pltpu


# ------------------------------ Pallas kernel ------------------------------- #

def _softh(x, w, centers, temperature):
    """Elementwise SoftH on a value. x: (..., D) f32, w: (n, D) f32 (loaded once)."""
    n = w.shape[0]
    # Cache the logits so the exp pass does not recompute (x - c_k)^2 (perf fix).
    logits = [(-temperature) * (x - c) ** 2 for c in centers]
    m = logits[0]
    for k in range(1, n):
        m = jnp.maximum(m, logits[k])
    num = jnp.zeros_like(x)
    den = jnp.zeros_like(x)
    for k in range(n):
        e = jnp.exp(logits[k] - m)
        den = den + e
        num = num + e * w[k]          # (D,) broadcasts over (..., D)
    return num / den                  # exact divide; see header note


def _fused_kernel(xh_ref, xc_ref, xn_ref, xo_ref,
                  wh_ref, wc_ref, wn_ref, wo_ref, wf_ref,
                  o_ref, s_ref, *, centers, temperature, input_dim):
    """Whole SoftHAtomLayer forward for one batch tile.

    xh/xc/xn/xo : (BT, A_t, D) input blocks (one per atom type)
    wh/wc/wn/wo : (n, D) bin heights;  wf: (n, 4D) final bin heights
    o_ref       : (BT, 1) per-molecule scalars (single store per call)
    s_ref       : (BT, 4D) VMEM scratch holding the lane-dense intermediate
    """
    D = input_dim
    atom_blocks = ((xh_ref, wh_ref), (xc_ref, wc_ref),
                   (xn_ref, wn_ref), (xo_ref, wo_ref))

    # ---- Stage 1: per-type SoftH + atom-axis sum, written segment-wise into
    # the (BT, 4D=128) VMEM scratch row (no HBM intermediate, no XLA concat).
    for seg, (x_ref, w_ref) in enumerate(atom_blocks):
        x = x_ref[...].astype(jnp.float32)          # (BT, A_t, D)
        w = w_ref[...].astype(jnp.float32)          # (n, D) — hoisted single load
        y = _softh(x, w, centers, temperature)      # (BT, A_t, D)
        s_ref[:, seg * D:(seg + 1) * D] = jnp.sum(y, axis=1)   # (BT, D)

    # ---- Stage 2: final SoftH over the lane-dense (BT, 4D) row + feature sum.
    s = s_ref[...]
    wf = wf_ref[...].astype(jnp.float32)            # (n, 4D) — hoisted single load
    yf = _softh(s, wf, centers, temperature)        # (BT, 4D)
    o_ref[...] = jnp.sum(yf, axis=-1, keepdims=True)            # (BT, 1), one store


# --------------------------------- wrapper ---------------------------------- #

def softh_atom_layer(x_h, x_c, x_n, x_o, params, centers, temperature):
    """Full SoftHAtomLayer forward in one pallas_call. Returns shape (B,)."""
    B, A_H, D = x_h.shape
    A_C, A_N, A_O = x_c.shape[1], x_n.shape[1], x_o.shape[1]
    n = params["H"].shape[0]
    assert len(centers) == n

    # Toy batch: one batch tile covering the whole batch (grid of 1 step).
    # For large B: shrink BT (a multiple of 8) so several "parallel" tiles shard
    # across v7x's two TensorCores, and re-budget block bytes against v7x's
    # 64 MiB physical / 32 MiB scoped VMEM (raise vmem_limit_bytes if needed).
    BT = B
    assert B % BT == 0
    num_tiles = B // BT

    kernel = functools.partial(
        _fused_kernel,
        centers=tuple(float(c) for c in centers),
        temperature=float(temperature),
        input_dim=D)

    out = pl.pallas_call(
        kernel,
        out_shape=jax.ShapeDtypeStruct((B, 1), jnp.float32),
        grid=(num_tiles,),
        in_specs=[
            pl.BlockSpec((BT, A_H, D), lambda i: (i, 0, 0)),
            pl.BlockSpec((BT, A_C, D), lambda i: (i, 0, 0)),
            pl.BlockSpec((BT, A_N, D), lambda i: (i, 0, 0)),
            pl.BlockSpec((BT, A_O, D), lambda i: (i, 0, 0)),
            pl.BlockSpec((n, D), lambda i: (0, 0)),
            pl.BlockSpec((n, D), lambda i: (0, 0)),
            pl.BlockSpec((n, D), lambda i: (0, 0)),
            pl.BlockSpec((n, D), lambda i: (0, 0)),
            pl.BlockSpec((n, 4 * D), lambda i: (0, 0)),
        ],
        out_specs=pl.BlockSpec((BT, 1), lambda i: (i, 0)),
        scratch_shapes=[pltpu.VMEM((BT, 4 * D), jnp.float32)],
        compiler_params=pltpu.CompilerParams(
            dimension_semantics=("parallel",)),
    )(x_h, x_c, x_n, x_o,
      params["H"], params["C"], params["N"], params["O"], params["F"])
    return out[:, 0]


# ---------------------------- pure-JAX reference ----------------------------- #

def _softh_ref(x, w, centers_arr, temperature):
    logits = -temperature * (x[..., None, :] - centers_arr[:, None]) ** 2
    p = jax.nn.softmax(logits, axis=-2)                      # (..., n, D)
    return jnp.sum(p * w, axis=-2)                           # (..., D)


def softh_atom_layer_ref(x_h, x_c, x_n, x_o, params, centers_arr, temperature):
    s_h = _softh_ref(x_h, params["H"], centers_arr, temperature).sum(axis=1)
    s_c = _softh_ref(x_c, params["C"], centers_arr, temperature).sum(axis=1)
    s_n = _softh_ref(x_n, params["N"], centers_arr, temperature).sum(axis=1)
    s_o = _softh_ref(x_o, params["O"], centers_arr, temperature).sum(axis=1)
    s = jnp.concatenate([s_h, s_c, s_n, s_o], axis=1)
    return _softh_ref(s, params["F"], centers_arr, temperature).sum(axis=1)


# ----------------------------------- main ------------------------------------ #

if __name__ == "__main__":
    # Hyperparameters (mirror SoftHAtomLayer(input_dim, n, temperature, a, b)).
    input_dim = 32
    n = 10
    temperature = 2.0
    a, b = -1.0, 1.0

    # Small shapes consistent with the forward: (batch, num_atoms, input_dim).
    B, num_H, num_C, num_N, num_O = 2, 8, 6, 4, 2

    key = jax.random.PRNGKey(0)
    kh, kc, kn, ko, kwh, kwc, kwn, kwo, kwf = jax.random.split(key, 9)

    x_h = jax.random.normal(kh, (B, num_H, input_dim), dtype=jnp.float32)
    x_c = jax.random.normal(kc, (B, num_C, input_dim), dtype=jnp.float32)
    x_n = jax.random.normal(kn, (B, num_N, input_dim), dtype=jnp.float32)
    x_o = jax.random.normal(ko, (B, num_O, input_dim), dtype=jnp.float32)

    # Learnable per-feature bin heights, shape (n, D) / (n, 4D).
    params = {
        "H": 0.1 * jax.random.normal(kwh, (n, input_dim), dtype=jnp.float32),
        "C": 0.1 * jax.random.normal(kwc, (n, input_dim), dtype=jnp.float32),
        "N": 0.1 * jax.random.normal(kwn, (n, input_dim), dtype=jnp.float32),
        "O": 0.1 * jax.random.normal(kwo, (n, input_dim), dtype=jnp.float32),
        "F": 0.1 * jax.random.normal(kwf, (n, 4 * input_dim), dtype=jnp.float32),
    }

    # Fixed breakpoints (buffer, not learned): linspace(a, b, n).
    centers = tuple(a + (b - a) * k / (n - 1) for k in range(n))
    centers_arr = jnp.asarray(centers, dtype=jnp.float32)

    fwd = jax.jit(functools.partial(
        softh_atom_layer, centers=centers, temperature=temperature))
    out = jax.block_until_ready(fwd(x_h, x_c, x_n, x_o, params))

    ref = jax.block_until_ready(
        softh_atom_layer_ref(x_h, x_c, x_n, x_o, params, centers_arr,
                             temperature))

    assert out.shape == (B,)
    assert jnp.allclose(out, ref, atol=1e-4, rtol=1e-4), (out, ref)
    print("KERNEL_OK")
</pallas_src>

<mosaic_0001>
module attributes {stable_mosaic.version = 11 : i64} {
  func.func @_fused_kernel(%arg0: i32, %arg1: memref<2x8x32xf32, #tpu.memory_space<vmem>>, %arg2: memref<2x6x32xf32, #tpu.memory_space<vmem>>, %arg3: memref<2x4x32xf32, #tpu.memory_space<vmem>>, %arg4: memref<2x2x32xf32, #tpu.memory_space<vmem>>, %arg5: memref<10x32xf32, #tpu.memory_space<vmem>>, %arg6: memref<10x32xf32, #tpu.memory_space<vmem>>, %arg7: memref<10x32xf32, #tpu.memory_space<vmem>>, %arg8: memref<10x32xf32, #tpu.memory_space<vmem>>, %arg9: memref<10x128xf32, #tpu.memory_space<vmem>>, %arg10: memref<2x1xf32, #tpu.memory_space<vmem>>, %arg11: memref<2x128xf32, #tpu.memory_space<vmem>>) attributes {dimension_semantics = [#tpu.dimension_semantics<parallel>], iteration_bounds = array<i64: 1>, scalar_prefetch = 0 : i64, scratch_operands = 1 : i64, tpu.core_type = #tpu.core_type<tc>, window_params = [{transform_indices = @transform_0, window_bounds = array<i64: 2, 8, 32>}, {transform_indices = @transform_1, window_bounds = array<i64: 2, 6, 32>}, {transform_indices = @transform_2, window_bounds = array<i64: 2, 4, 32>}, {transform_indices = @transform_3, window_bounds = array<i64: 2, 2, 32>}, {pipeline_mode = #tpu.pipeline_mode<synchronous>, transform_indices = @transform_4, window_bounds = array<i64: 10, 32>}, {pipeline_mode = #tpu.pipeline_mode<synchronous>, transform_indices = @transform_5, window_bounds = array<i64: 10, 32>}, {pipeline_mode = #tpu.pipeline_mode<synchronous>, transform_indices = @transform_6, window_bounds = array<i64: 10, 32>}, {pipeline_mode = #tpu.pipeline_mode<synchronous>, transform_indices = @transform_7, window_bounds = array<i64: 10, 32>}, {pipeline_mode = #tpu.pipeline_mode<synchronous>, transform_indices = @transform_8, window_bounds = array<i64: 10, 128>}, {transform_indices = @transform_9, window_bounds = array<i64: 2, 1>}]} {
    %c0 = arith.constant 0 : index
    %c0_0 = arith.constant 0 : index
    %c0_1 = arith.constant 0 : index
    %0 = vector.load %arg1[%c0, %c0_0, %c0_1] : memref<2x8x32xf32, #tpu.memory_space<vmem>>, vector<2x8x32xf32>
    %c0_2 = arith.constant 0 : index
    %c0_3 = arith.constant 0 : index
    %1 = vector.load %arg5[%c0_2, %c0_3] : memref<10x32xf32, #tpu.memory_space<vmem>>, vector<10x32xf32>
    %cst = arith.constant -1.000000e+00 : f32
    %2 = vector.broadcast %cst : f32 to vector<2x8x32xf32>
    %3 = arith.subf %0, %2 : vector<2x8x32xf32>
    %4 = arith.mulf %3, %3 : vector<2x8x32xf32>
    %cst_4 = arith.constant -2.000000e+00 : f32
    %5 = vector.broadcast %cst_4 : f32 to vector<2x8x32xf32>
    %6 = arith.mulf %5, %4 : vector<2x8x32xf32>
    %cst_5 = arith.constant -0.777777791 : f32
    %7 = vector.broadcast %cst_5 : f32 to vector<2x8x32xf32>
    %8 = arith.subf %0, %7 : vector<2x8x32xf32>
    %9 = arith.mulf %8, %8 : vector<2x8x32xf32>
    %cst_6 = arith.constant -2.000000e+00 : f32
    %10 = vector.broadcast %cst_6 : f32 to vector<2x8x32xf32>
    %11 = arith.mulf %10, %9 : vector<2x8x32xf32>
    %cst_7 = arith.constant -0.555555582 : f32
    %12 = vector.broadcast %cst_7 : f32 to vector<2x8x32xf32>
    %13 = arith.subf %0, %12 : vector<2x8x32xf32>
    %14 = arith.mulf %13, %13 : vector<2x8x32xf32>
    %cst_8 = arith.constant -2.000000e+00 : f32
    %15 = vector.broadcast %cst_8 : f32 to vector<2x8x32xf32>
    %16 = arith.mulf %15, %14 : vector<2x8x32xf32>
    %cst_9 = arith.constant -0.333333343 : f32
    %17 = vector.broadcast %cst_9 : f32 to vector<2x8x32xf32>
    %18 = arith.subf %0, %17 : vector<2x8x32xf32>
    %19 = arith.mulf %18, %18 : vector<2x8x32xf32>
    %cst_10 = arith.constant -2.000000e+00 : f32
    %20 = vector.broadcast %cst_10 : f32 to vector<2x8x32xf32>
    %21 = arith.mulf %20, %19 : vector<2x8x32xf32>
    %cst_11 = arith.constant -0.111111112 : f32
    %22 = vector.broadcast %cst_11 : f32 to vector<2x8x32xf32>
    %23 = arith.subf %0, %22 : vector<2x8x32xf32>
    %24 = arith.mulf %23, %23 : vector<2x8x32xf32>
    %cst_12 = arith.constant -2.000000e+00 : f32
    %25 = vector.broadcast %cst_12 : f32 to vector<2x8x32xf32>
    %26 = arith.mulf %25, %24 : vector<2x8x32xf32>
    %cst_13 = arith.constant 0.111111112 : f32
    %27 = vector.broadcast %cst_13 : f32 to vector<2x8x32xf32>
    %28 = arith.subf %0, %27 : vector<2x8x32xf32>
    %29 = arith.mulf %28, %28 : vector<2x8x32xf32>
    %cst_14 = arith.constant -2.000000e+00 : f32
    %30 = vector.broadcast %cst_14 : f32 to vector<2x8x32xf32>
    %31 = arith.mulf %30, %29 : vector<2x8x32xf32>
    %cst_15 = arith.constant 0.333333343 : f32
    %32 = vector.broadcast %cst_15 : f32 to vector<2x8x32xf32>
    %33 = arith.subf %0, %32 : vector<2x8x32xf32>
    %34 = arith.mulf %33, %33 : vector<2x8x32xf32>
    %cst_16 = arith.constant -2.000000e+00 : f32
    %35 = vector.broadcast %cst_16 : f32 to vector<2x8x32xf32>
    %36 = arith.mulf %35, %34 : vector<2x8x32xf32>
    %cst_17 = arith.constant 0.555555582 : f32
    %37 = vector.broadcast %cst_17 : f32 to vector<2x8x32xf32>
    %38 = arith.subf %0, %37 : vector<2x8x32xf32>
    %39 = arith.mulf %38, %38 : vector<2x8x32xf32>
    %cst_18 = arith.constant -2.000000e+00 : f32
    %40 = vector.broadcast %cst_18 : f32 to vector<2x8x32xf32>
    %41 = arith.mulf %40, %39 : vector<2x8x32xf32>
    %cst_19 = arith.constant 0.777777791 : f32
    %42 = vector.broadcast %cst_19 : f32 to vector<2x8x32xf32>
    %43 = arith.subf %0, %42 : vector<2x8x32xf32>
    %44 = arith.mulf %43, %43 : vector<2x8x32xf32>
    %cst_20 = arith.constant -2.000000e+00 : f32
    %45 = vector.broadcast %cst_20 : f32 to vector<2x8x32xf32>
    %46 = arith.mulf %45, %44 : vector<2x8x32xf32>
    %cst_21 = arith.constant 1.000000e+00 : f32
    %47 = vector.broadcast %cst_21 : f32 to vector<2x8x32xf32>
    %48 = arith.subf %0, %47 : vector<2x8x32xf32>
    %49 = arith.mulf %48, %48 : vector<2x8x32xf32>
    %cst_22 = arith.constant -2.000000e+00 : f32
    %50 = vector.broadcast %cst_22 : f32 to vector<2x8x32xf32>
    %51 = arith.mulf %50, %49 : vector<2x8x32xf32>
    %52 = arith.maximumf %6, %11 : vector<2x8x32xf32>
    %53 = arith.maximumf %52, %16 : vector<2x8x32xf32>
    %54 = arith.maximumf %53, %21 : vector<2x8x32xf32>
    %55 = arith.maximumf %54, %26 : vector<2x8x32xf32>
    %56 = arith.maximumf %55, %31 : vector<2x8x32xf32>
    %57 = arith.maximumf %56, %36 : vector<2x8x32xf32>
    %58 = arith.maximumf %57, %41 : vector<2x8x32xf32>
    %59 = arith.maximumf %58, %46 : vector<2x8x32xf32>
    %60 = arith.maximumf %59, %51 : vector<2x8x32xf32>
    %cst_23 = arith.constant 0.000000e+00 : f32
    %61 = vector.broadcast %cst_23 : f32 to vector<2x8x32xf32>
    %cst_24 = arith.constant 0.000000e+00 : f32
    %62 = vector.broadcast %cst_24 : f32 to vector<2x8x32xf32>
    %63 = arith.subf %6, %60 : vector<2x8x32xf32>
    %64 = math.exp %63 : vector<2x8x32xf32>
    %65 = arith.addf %62, %64 : vector<2x8x32xf32>
    %66 = vector.extract_strided_slice %1 {offsets = [0, 0], sizes = [1, 32], strides = [1, 1]} : vector<10x32xf32> to vector<1x32xf32>
    %67 = vector.shape_cast %66 : vector<1x32xf32> to vector<32xf32>
    %68 = vector.shape_cast %67 : vector<32xf32> to vector<1x1x32xf32>
    %69 = vector.broadcast %68 : vector<1x1x32xf32> to vector<2x8x32xf32>
    %70 = arith.mulf %64, %69 : vector<2x8x32xf32>
    %71 = arith.addf %61, %70 : vector<2x8x32xf32>
    %72 = arith.subf %11, %60 : vector<2x8x32xf32>
    %73 = math.exp %72 : vector<2x8x32xf32>
    %74 = arith.addf %65, %73 : vector<2x8x32xf32>
    %75 = vector.extract_strided_slice %1 {offsets = [1, 0], sizes = [1, 32], strides = [1, 1]} : vector<10x32xf32> to vector<1x32xf32>
    %76 = vector.shape_cast %75 : vector<1x32xf32> to vector<32xf32>
    %77 = vector.shape_cast %76 : vector<32xf32> to vector<1x1x32xf32>
    %78 = vector.broadcast %77 : vector<1x1x32xf32> to vector<2x8x32xf32>
    %79 = arith.mulf %73, %78 : vector<2x8x32xf32>
    %80 = arith.addf %71, %79 : vector<2x8x32xf32>
    %81 = arith.subf %16, %60 : vector<2x8x32xf32>
    %82 = math.exp %81 : vector<2x8x32xf32>
    %83 = arith.addf %74, %82 : vector<2x8x32xf32>
    %84 = vector.extract_strided_slice %1 {offsets = [2, 0], sizes = [1, 32], strides = [1, 1]} : vector<10x32xf32> to vector<1x32xf32>
    %85 = vector.shape_cast %84 : vector<1x32xf32> to vector<32xf32>
    %86 = vector.shape_cast %85 : vector<32xf32> to vector<1x1x32xf32>
    %87 = vector.broadcast %86 : vector<1x1x32xf32> to vector<2x8x32xf32>
    %88 = arith.mulf %82, %87 : vector<2x8x32xf32>
    %89 = arith.addf %80, %88 : vector<2x8x32xf32>
    %90 = arith.subf %21, %60 : vector<2x8x32xf32>
    %91 = math.exp %90 : vector<2x8x32xf32>
    %92 = arith.addf %83, %91 : vector<2x8x32xf32>
    %93 = vector.extract_strided_slice %1 {offsets = [3, 0], sizes = [1, 32], strides = [1, 1]} : vector<10x32xf32> to vector<1x32xf32>
    %94 = vector.shape_cast %93 : vector<1x32xf32> to vector<32xf32>
    %95 = vector.shape_cast %94 : vector<32xf32> to vector<1x1x32xf32>
    %96 = vector.broadcast %95 : vector<1x1x32xf32> to vector<2x8x32xf32>
    %97 = arith.mulf %91, %96 : vector<2x8x32xf32>
    %98 = arith.addf %89, %97 : vector<2x8x32xf32>
    %99 = arith.subf %26, %60 : vector<2x8x32xf32>
    %100 = math.exp %99 : vector<2x8x32xf32>
    %101 = arith.addf %92, %100 : vector<2x8x32xf32>
    %102 = vector.extract_strided_slice %1 {offsets = [4, 0], sizes = [1, 32], strides = [1, 1]} : vector<10x32xf32> to vector<1x32xf32>
    %103 = vector.shape_cast %102 : vector<1x32xf32> to vector<32xf32>
    %104 = vector.shape_cast %103 : vector<32xf32> to vector<1x1x32xf32>
    %105 = vector.broadcast %104 : vector<1x1x32xf32> to vector<2x8x32xf32>
    %106 = arith.mulf %100, %105 : vector<2x8x32xf32>
    %107 = arith.addf %98, %106 : vector<2x8x32xf32>
    %108 = arith.subf %31, %60 : vector<2x8x32xf32>
    %109 = math.exp %108 : vector<2x8x32xf32>
    %110 = arith.addf %101, %109 : vector<2x8x32xf32>
    %111 = vector.extract_strided_slice %1 {offsets = [5, 0], sizes = [1, 32], strides = [1, 1]} : vector<10x32xf32> to vector<1x32xf32>
    %112 = vector.shape_cast %111 : vector<1x32xf32> to vector<32xf32>
    %113 = vector.shape_cast %112 : vector<32xf32> to vector<1x1x32xf32>
    %114 = vector.broadcast %113 : vector<1x1x32xf32> to vector<2x8x32xf32>
    %115 = arith.mulf %109, %114 : vector<2x8x32xf32>
    %116 = arith.addf %107, %115 : vector<2x8x32xf32>
    %117 = arith.subf %36, %60 : vector<2x8x32xf32>
    %118 = math.exp %117 : vector<2x8x32xf32>
    %119 = arith.addf %110, %118 : vector<2x8x32xf32>
    %120 = vector.extract_strided_slice %1 {offsets = [6, 0], sizes = [1, 32], strides = [1, 1]} : vector<10x32xf32> to vector<1x32xf32>
    %121 = vector.shape_cast %120 : vector<1x32xf32> to vector<32xf32>
    %122 = vector.shape_cast %121 : vector<32xf32> to vector<1x1x32xf32>
    %123 = vector.broadcast %122 : vector<1x1x32xf32> to vector<2x8x32xf32>
    %124 = arith.mulf %118, %123 : vector<2x8x32xf32>
    %125 = arith.addf %116, %124 : vector<2x8x32xf32>
    %126 = arith.subf %41, %60 : vector<2x8x32xf32>
    %127 = math.exp %126 : vector<2x8x32xf32>
    %128 = arith.addf %119, %127 : vector<2x8x32xf32>
    %129 = vector.extract_strided_slice %1 {offsets = [7, 0], sizes = [1, 32], strides = [1, 1]} : vector<10x32xf32> to vector<1x32xf32>
    %130 = vector.shape_cast %129 : vector<1x32xf32> to vector<32xf32>
    %131 = vector.shape_cast %130 : vector<32xf32> to vector<1x1x32xf32>
    %132 = vector.broadcast %131 : vector<1x1x32xf32> to vector<2x8x32xf32>
    %133 = arith.mulf %127, %132 : vector<2x8x32xf32>
    %134 = arith.addf %125, %133 : vector<2x8x32xf32>
    %135 = arith.subf %46, %60 : vector<2x8x32xf32>
    %136 = math.exp %135 : vector<2x8x32xf32>
    %137 = arith.addf %128, %136 : vector<2x8x32xf32>
    %138 = vector.extract_strided_slice %1 {offsets = [8, 0], sizes = [1, 32], strides = [1, 1]} : vector<10x32xf32> to vector<1x32xf32>
    %139 = vector.shape_cast %138 : vector<1x32xf32> to vector<32xf32>
    %140 = vector.shape_cast %139 : vector<32xf32> to vector<1x1x32xf32>
    %141 = vector.broadcast %140 : vector<1x1x32xf32> to vector<2x8x32xf32>
    %142 = arith.mulf %136, %141 : vector<2x8x32xf32>
    %143 = arith.addf %134, %142 : vector<2x8x32xf32>
    %144 = arith.subf %51, %60 : vector<2x8x32xf32>
    %145 = math.exp %144 : vector<2x8x32xf32>
    %146 = arith.addf %137, %145 : vector<2x8x32xf32>
    %147 = vector.extract_strided_slice %1 {offsets = [9, 0], sizes = [1, 32], strides = [1, 1]} : vector<10x32xf32> to vector<1x32xf32>
    %148 = vector.shape_cast %147 : vector<1x32xf32> to vector<32xf32>
    %149 = vector.shape_cast %148 : vector<32xf32> to vector<1x1x32xf32>
    %150 = vector.broadcast %149 : vector<1x1x32xf32> to vector<2x8x32xf32>
    %151 = arith.mulf %145, %150 : vector<2x8x32xf32>
    %152 = arith.addf %143, %151 : vector<2x8x32xf32>
    %153 = arith.divf %152, %146 : vector<2x8x32xf32>
    %cst_25 = arith.constant dense<0.000000e+00> : vector<2x32xf32>
    %154 = vector.multi_reduction <add>, %153, %cst_25 [1] : vector<2x8x32xf32> to vector<2x32xf32>
    %c0_26 = arith.constant 0 : index
    %c0_27 = arith.constant 0 : index
    %155 = vector.load %arg11[%c0_26, %c0_27] : memref<2x128xf32, #tpu.memory_space<vmem>>, vector<2x32xf32>
    tpu.vector_store %arg11[%c0_26, %c0_27], %154 {strides = array<i32>} : memref<2x128xf32, #tpu.memory_space<vmem>>, vector<2x32xf32>,
    %c0_28 = arith.constant 0 : index
    %c0_29 = arith.constant 0 : index
    %c0_30 = arith.constant 0 : index
    %156 = vector.load %arg2[%c0_28, %c0_29, %c0_30] : memref<2x6x32xf32, #tpu.memory_space<vmem>>, vector<2x6x32xf32>
    %c0_31 = arith.constant 0 : index
    %c0_32 = arith.constant 0 : index
    %157 = vector.load %arg6[%c0_31, %c0_32] : memref<10x32xf32, #tpu.memory_space<vmem>>, vector<10x32xf32>
    %cst_33 = arith.constant -1.000000e+00 : f32
    %158 = vector.broadcast %cst_33 : f32 to vector<2x6x32xf32>
    %159 = arith.subf %156, %158 : vector<2x6x32xf32>
    %160 = arith.mulf %159, %159 : vector<2x6x32xf32>
    %cst_34 = arith.constant -2.000000e+00 : f32
    %161 = vector.broadcast %cst_34 : f32 to vector<2x6x32xf32>
    %162 = arith.mulf %161, %160 : vector<2x6x32xf32>
    %cst_35 = arith.constant -0.777777791 : f32
    %163 = vector.broadcast %cst_35 : f32 to vector<2x6x32xf32>
    %164 = arith.subf %156, %163 : vector<2x6x32xf32>
    %165 = arith.mulf %164, %164 : vector<2x6x32xf32>
    %cst_36 = arith.constant -2.000000e+00 : f32
    %166 = vector.broadcast %cst_36 : f32 to vector<2x6x32xf32>
    %167 = arith.mulf %166, %165 : vector<2x6x32xf32>
    %cst_37 = arith.constant -0.555555582 : f32
    %168 = vector.broadcast %cst_37 : f32 to vector<2x6x32xf32>
    %169 = arith.subf %156, %168 : vector<2x6x32xf32>
    %170 = arith.mulf %169, %169 : vector<2x6x32xf32>
    %cst_38 = arith.constant -2.000000e+00 : f32
    %171 = vector.broadcast %cst_38 : f32 to vector<2x6x32xf32>
    %172 = arith.mulf %171, %170 : vector<2x6x32xf32>
    %cst_39 = arith.constant -0.333333343 : f32
    %173 = vector.broadcast %cst_39 : f32 to vector<2x6x32xf32>
    %174 = arith.subf %156, %173 : vector<2x6x32xf32>
    %175 = arith.mulf %174, %174 : vector<2x6x32xf32>
    %cst_40 = arith.constant -2.000000e+00 : f32
    %176 = vector.broadcast %cst_40 : f32 to vector<2x6x32xf32>
    %177 = arith.mulf %176, %175 : vector<2x6x32xf32>
    %cst_41 = arith.constant -0.111111112 : f32
    %178 = vector.broadcast %cst_41 : f32 to vector<2x6x32xf32>
    %179 = arith.subf %156, %178 : vector<2x6x32xf32>
    %180 = arith.mulf %179, %179 : vector<2x6x32xf32>
    %cst_42 = arith.constant -2.000000e+00 : f32
    %181 = vector.broadcast %cst_42 : f32 to vector<2x6x32xf32>
    %182 = arith.mulf %181, %180 : vector<2x6x32xf32>
    %cst_43 = arith.constant 0.111111112 : f32
    %183 = vector.broadcast %cst_43 : f32 to vector<2x6x32xf32>
    %184 = arith.subf %156, %183 : vector<2x6x32xf32>
    %185 = arith.mulf %184, %184 : vector<2x6x32xf32>
    %cst_44 = arith.constant -2.000000e+00 : f32
    %186 = vector.broadcast %cst_44 : f32 to vector<2x6x32xf32>
    %187 = arith.mulf %186, %185 : vector<2x6x32xf32>
    %cst_45 = arith.constant 0.333333343 : f32
    %188 = vector.broadcast %cst_45 : f32 to vector<2x6x32xf32>
    %189 = arith.subf %156, %188 : vector<2x6x32xf32>
    %190 = arith.mulf %189, %189 : vector<2x6x32xf32>
    %cst_46 = arith.constant -2.000000e+00 : f32
    %191 = vector.broadcast %cst_46 : f32 to vector<2x6x32xf32>
    %192 = arith.mulf %191, %190 : vector<2x6x32xf32>
    %cst_47 = arith.constant 0.555555582 : f32
    %193 = vector.broadcast %cst_47 : f32 to vector<2x6x32xf32>
    %194 = arith.subf %156, %193 : vector<2x6x32xf32>
    %195 = arith.mulf %194, %194 : vector<2x6x32xf32>
    %cst_48 = arith.constant -2.000000e+00 : f32
    %196 = vector.broadcast %cst_48 : f32 to vector<2x6x32xf32>
    %197 = arith.mulf %196, %195 : vector<2x6x32xf32>
    %cst_49 = arith.constant 0.777777791 : f32
    %198 = vector.broadcast %cst_49 : f32 to vector<2x6x32xf32>
    %199 = arith.subf %156, %198 : vector<2x6x32xf32>
    %200 = arith.mulf %199, %199 : vector<2x6x32xf32>
    %cst_50 = arith.constant -2.000000e+00 : f32
    %201 = vector.broadcast %cst_50 : f32 to vector<2x6x32xf32>
    %202 = arith.mulf %201, %200 : vector<2x6x32xf32>
    %cst_51 = arith.constant 1.000000e+00 : f32
    %203 = vector.broadcast %cst_51 : f32 to vector<2x6x32xf32>
    %204 = arith.subf %156, %203 : vector<2x6x32xf32>
    %205 = arith.mulf %204, %204 : vector<2x6x32xf32>
    %cst_52 = arith.constant -2.000000e+00 : f32
    %206 = vector.broadcast %cst_52 : f32 to vector<2x6x32xf32>
    %207 = arith.mulf %206, %205 : vector<2x6x32xf32>
    %208 = arith.maximumf %162, %167 : vector<2x6x32xf32>
    %209 = arith.maximumf %208, %172 : vector<2x6x32xf32>
    %210 = arith.maximumf %209, %177 : vector<2x6x32xf32>
    %211 = arith.maximumf %210, %182 : vector<2x6x32xf32>
    %212 = arith.maximumf %211, %187 : vector<2x6x32xf32>
    %213 = arith.maximumf %212, %192 : vector<2x6x32xf32>
    %214 = arith.maximumf %213, %197 : vector<2x6x32xf32>
    %215 = arith.maximumf %214, %202 : vector<2x6x32xf32>
    %216 = arith.maximumf %215, %207 : vector<2x6x32xf32>
    %cst_53 = arith.constant 0.000000e+00 : f32
    %217 = vector.broadcast %cst_53 : f32 to vector<2x6x32xf32>
    %cst_54 = arith.constant 0.000000e+00 : f32
    %218 = vector.broadcast %cst_54 : f32 to vector<2x6x32xf32>
    %219 = arith.subf %162, %216 : vector<2x6x32xf32>
    %220 = math.exp %219 : vector<2x6x32xf32>
    %221 = arith.addf %218, %220 : vector<2x6x32xf32>
    %222 = vector.extract_strided_slice %157 {offsets = [0, 0], sizes = [1, 32], strides = [1, 1]} : vector<10x32xf32> to vector<1x32xf32>
    %223 = vector.shape_cast %222 : vector<1x32xf32> to vector<32xf32>
    %224 = vector.shape_cast %223 : vector<32xf32> to vector<1x1x32xf32>
    %225 = vector.broadcast %224 : vector<1x1x32xf32> to vector<2x6x32xf32>
    %226 = arith.mulf %220, %225 : vector<2x6x32xf32>
    %227 = arith.addf %217, %226 : vector<2x6x32xf32>
    %228 = arith.subf %167, %216 : vector<2x6x32xf32>
    %229 = math.exp %228 : vector<2x6x32xf32>
    %230 = arith.addf %221, %229 : vector<2x6x32xf32>
    %231 = vector.extract_strided_slice %157 {offsets = [1, 0], sizes = [1, 32], strides = [1, 1]} : vector<10x32xf32> to vector<1x32xf32>
    %232 = vector.shape_cast %231 : vector<1x32xf32> to vector<32xf32>
    %233 = vector.shape_cast %232 : vector<32xf32> to vector<1x1x32xf32>
    %234 = vector.broadcast %233 : vector<1x1x32xf32> to vector<2x6x32xf32>
    %235 = arith.mulf %229, %234 : vector<2x6x32xf32>
    %236 = arith.addf %227, %235 : vector<2x6x32xf32>
    %237 = arith.subf %172, %216 : vector<2x6x32xf32>
    %238 = math.exp %237 : vector<2x6x32xf32>
    %239 = arith.addf %230, %238 : vector<2x6x32xf32>
    %240 = vector.extract_strided_slice %157 {offsets = [2, 0], sizes = [1, 32], strides = [1, 1]} : vector<10x32xf32> to vector<1x32xf32>
    %241 = vector.shape_cast %240 : vector<1x32xf32> to vector<32xf32>
    %242 = vector.shape_cast %241 : vector<32xf32> to vector<1x1x32xf32>
    %243 = vector.broadcast %242 : vector<1x1x32xf32> to vector<2x6x32xf32>
    %244 = arith.mulf %238, %243 : vector<2x6x32xf32>
    %245 = arith.addf %236, %244 : vector<2x6x32xf32>
    %246 = arith.subf %177, %216 : vector<2x6x32xf32>
    %247 = math.exp %246 : vector<2x6x32xf32>
    %248 = arith.addf %239, %247 : vector<2x6x32xf32>
    %249 = vector.extract_strided_slice %157 {offsets = [3, 0], sizes = [1, 32], strides = [1, 1]} : vector<10x32xf32> to vector<1x32xf32>
    %250 = vector.shape_cast %249 : vector<1x32xf32> to vector<32xf32>
    %251 = vector.shape_cast %250 : vector<32xf32> to vector<1x1x32xf32>
    %252 = vector.broadcast %251 : vector<1x1x32xf32> to vector<2x6x32xf32>
    %253 = arith.mulf %247, %252 : vector<2x6x32xf32>
    %254 = arith.addf %245, %253 : vector<2x6x32xf32>
    %255 = arith.subf %182, %216 : vector<2x6x32xf32>
    %256 = math.exp %255 : vector<2x6x32xf32>
    %257 = arith.addf %248, %256 : vector<2x6x32xf32>
    %258 = vector.extract_strided_slice %157 {offsets = [4, 0], sizes = [1, 32], strides = [1, 1]} : vector<10x32xf32> to vector<1x32xf32>
    %259 = vector.shape_cast %258 : vector<1x32xf32> to vector<32xf32>
    %260 = vector.shape_cast %259 : vector<32xf32> to vector<1x1x32xf32>
    %261 = vector.broadcast %260 : vector<1x1x32xf32> to vector<2x6x32xf32>
    %262 = arith.mulf %256, %261 : vector<2x6x32xf32>
    %263 = arith.addf %254, %262 : vector<2x6x32xf32>
    %264 = arith.subf %187, %216 : vector<2x6x32xf32>
    %265 = math.exp %264 : vector<2x6x32xf32>
    %266 = arith.addf %257, %265 : vector<2x6x32xf32>
    %267 = vector.extract_strided_slice %157 {offsets = [5, 0], sizes = [1, 32], strides = [1, 1]} : vector<10x32xf32> to vector<1x32xf32>
    %268 = vector.shape_cast %267 : vector<1x32xf32> to vector<32xf32>
    %269 = vector.shape_cast %268 : vector<32xf32> to vector<1x1x32xf32>
    %270 = vector.broadcast %269 : vector<1x1x32xf32> to vector<2x6x32xf32>
    %271 = arith.mulf %265, %270 : vector<2x6x32xf32>
    %272 = arith.addf %263, %271 : vector<2x6x32xf32>
    %273 = arith.subf %192, %216 : vector<2x6x32xf32>
    %274 = math.exp %273 : vector<2x6x32xf32>
    %275 = arith.addf %266, %274 : vector<2x6x32xf32>
    %276 = vector.extract_strided_slice %157 {offsets = [6, 0], sizes = [1, 32], strides = [1, 1]} : vector<10x32xf32> to vector<1x32xf32>
    %277 = vector.shape_cast %276 : vector<1x32xf32> to vector<32xf32>
    %278 = vector.shape_cast %277 : vector<32xf32> to vector<1x1x32xf32>
    %279 = vector.broadcast %278 : vector<1x1x32xf32> to vector<2x6x32xf32>
    %280 = arith.mulf %274, %279 : vector<2x6x32xf32>
    %281 = arith.addf %272, %280 : vector<2x6x32xf32>
    %282 = arith.subf %197, %216 : vector<2x6x32xf32>
    %283 = math.exp %282 : vector<2x6x32xf32>
    %284 = arith.addf %275, %283 : vector<2x6x32xf32>
    %285 = vector.extract_strided_slice %157 {offsets = [7, 0], sizes = [1, 32], strides = [1, 1]} : vector<10x32xf32> to vector<1x32xf32>
    %286 = vector.shape_cast %285 : vector<1x32xf32> to vector<32xf32>
    %287 = vector.shape_cast %286 : vector<32xf32> to vector<1x1x32xf32>
    %288 = vector.broadcast %287 : vector<1x1x32xf32> to vector<2x6x32xf32>
    %289 = arith.mulf %283, %288 : vector<2x6x32xf32>
    %290 = arith.addf %281, %289 : vector<2x6x32xf32>
    %291 = arith.subf %202, %216 : vector<2x6x32xf32>
    %292 = math.exp %291 : vector<2x6x32xf32>
    %293 = arith.addf %284, %292 : vector<2x6x32xf32>
    %294 = vector.extract_strided_slice %157 {offsets = [8, 0], sizes = [1, 32], strides = [1, 1]} : vector<10x32xf32> to vector<1x32xf32>
    %295 = vector.shape_cast %294 : vector<1x32xf32> to vector<32xf32>
    %296 = vector.shape_cast %295 : vector<32xf32> to vector<1x1x32xf32>
    %297 = vector.broadcast %296 : vector<1x1x32xf32> to vector<2x6x32xf32>
    %298 = arith.mulf %292, %297 : vector<2x6x32xf32>
    %299 = arith.addf %290, %298 : vector<2x6x32xf32>
    %300 = arith.subf %207, %216 : vector<2x6x32xf32>
    %301 = math.exp %300 : vector<2x6x32xf32>
    %302 = arith.addf %293, %301 : vector<2x6x32xf32>
    %303 = vector.extract_strided_slice %157 {offsets = [9, 0], sizes = [1, 32], strides = [1, 1]} : vector<10x32xf32> to vector<1x32xf32>
    %304 = vector.shape_cast %303 : vector<1x32xf32> to vector<32xf32>
    %305 = vector.shape_cast %304 : vector<32xf32> to vector<1x1x32xf32>
    %306 = vector.broadcast %305 : vector<1x1x32xf32> to vector<2x6x32xf32>
    %307 = arith.mulf %301, %306 : vector<2x6x32xf32>
    %308 = arith.addf %299, %307 : vector<2x6x32xf32>
    %309 = arith.divf %308, %302 : vector<2x6x32xf32>
    %cst_55 = arith.constant dense<0.000000e+00> : vector<2x32xf32>
    %310 = vector.multi_reduction <add>, %309, %cst_55 [1] : vector<2x6x32xf32> to vector<2x32xf32>
    %c0_56 = arith.constant 0 : index
    %c32 = arith.constant 32 : index
    %311 = vector.load %arg11[%c0_56, %c32] : memref<2x128xf32, #tpu.memory_space<vmem>>, vector<2x32xf32>
    tpu.vector_store %arg11[%c0_56, %c32], %310 {strides = array<i32>} : memref<2x128xf32, #tpu.memory_space<vmem>>, vector<2x32xf32>,
    %c0_57 = arith.constant 0 : index
    %c0_58 = arith.constant 0 : index
    %c0_59 = arith.constant 0 : index
    %312 = vector.load %arg3[%c0_57, %c0_58, %c0_59] : memref<2x4x32xf32, #tpu.memory_space<vmem>>, vector<2x4x32xf32>
    %c0_60 = arith.constant 0 : index
    %c0_61 = arith.constant 0 : index
    %313 = vector.load %arg7[%c0_60, %c0_61] : memref<10x32xf32, #tpu.memory_space<vmem>>, vector<10x32xf32>
    %cst_62 = arith.constant -1.000000e+00 : f32
    %314 = vector.broadcast %cst_62 : f32 to vector<2x4x32xf32>
    %315 = arith.subf %312, %314 : vector<2x4x32xf32>
    %316 = arith.mulf %315, %315 : vector<2x4x32xf32>
    %cst_63 = arith.constant -2.000000e+00 : f32
    %317 = vector.broadcast %cst_63 : f32 to vector<2x4x32xf32>
    %318 = arith.mulf %317, %316 : vector<2x4x32xf32>
    %cst_64 = arith.constant -0.777777791 : f32
    %319 = vector.broadcast %cst_64 : f32 to vector<2x4x32xf32>
    %320 = arith.subf %312, %319 : vector<2x4x32xf32>
    %321 = arith.mulf %320, %320 : vector<2x4x32xf32>
    %cst_65 = arith.constant -2.000000e+00 : f32
    %322 = vector.broadcast %cst_65 : f32 to vector<2x4x32xf32>
    %323 = arith.mulf %322, %321 : vector<2x4x32xf32>
    %cst_66 = arith.constant -0.555555582 : f32
    %324 = vector.broadcast %cst_66 : f32 to vector<2x4x32xf32>
    %325 = arith.subf %312, %324 : vector<2x4x32xf32>
    %326 = arith.mulf %325, %325 : vector<2x4x32xf32>
    %cst_67 = arith.constant -2.000000e+00 : f32
    %327 = vector.broadcast %cst_67 : f32 to vector<2x4x32xf32>
    %328 = arith.mulf %327, %326 : vector<2x4x32xf32>
    %cst_68 = arith.constant -0.333333343 : f32
    %329 = vector.broadcast %cst_68 : f32 to vector<2x4x32xf32>
    %330 = arith.subf %312, %329 : vector<2x4x32xf32>
    %331 = arith.mulf %330, %330 : vector<2x4x32xf32>
    %cst_69 = arith.constant -2.000000e+00 : f32
    %332 = vector.broadcast %cst_69 : f32 to vector<2x4x32xf32>
    %333 = arith.mulf %332, %331 : vector<2x4x32xf32>
    %cst_70 = arith.constant -0.111111112 : f32
    %334 = vector.broadcast %cst_70 : f32 to vector<2x4x32xf32>
    %335 = arith.subf %312, %334 : vector<2x4x32xf32>
    %336 = arith.mulf %335, %335 : vector<2x4x32xf32>
    %cst_71 = arith.constant -2.000000e+00 : f32
    %337 = vector.broadcast %cst_71 : f32 to vector<2x4x32xf32>
    %338 = arith.mulf %337, %336 : vector<2x4x32xf32>
    %cst_72 = arith.constant 0.111111112 : f32
    %339 = vector.broadcast %cst_72 : f32 to vector<2x4x32xf32>
    %340 = arith.subf %312, %339 : vector<2x4x32xf32>
    %341 = arith.mulf %340, %340 : vector<2x4x32xf32>
    %cst_73 = arith.constant -2.000000e+00 : f32
    %342 = vector.broadcast %cst_73 : f32 to vector<2x4x32xf32>
    %343 = arith.mulf %342, %341 : vector<2x4x32xf32>
    %cst_74 = arith.constant 0.333333343 : f32
    %344 = vector.broadcast %cst_74 : f32 to vector<2x4x32xf32>
    %345 = arith.subf %312, %344 : vector<2x4x32xf32>
    %346 = arith.mulf %345, %345 : vector<2x4x32xf32>
    %cst_75 = arith.constant -2.000000e+00 : f32
    %347 = vector.broadcast %cst_75 : f32 to vector<2x4x32xf32>
    %348 = arith.mulf %347, %346 : vector<2x4x32xf32>
    %cst_76 = arith.constant 0.555555582 : f32
    %349 = vector.broadcast %cst_76 : f32 to vector<2x4x32xf32>
    %350 = arith.subf %312, %349 : vector<2x4x32xf32>
    %351 = arith.mulf %350, %350 : vector<2x4x32xf32>
    %cst_77 = arith.constant -2.000000e+00 : f32
    %352 = vector.broadcast %cst_77 : f32 to vector<2x4x32xf32>
    %353 = arith.mulf %352, %351 : vector<2x4x32xf32>
    %cst_78 = arith.constant 0.777777791 : f32
    %354 = vector.broadcast %cst_78 : f32 to vector<2x4x32xf32>
    %355 = arith.subf %312, %354 : vector<2x4x32xf32>
    %356 = arith.mulf %355, %355 : vector<2x4x32xf32>
    %cst_79 = arith.constant -2.000000e+00 : f32
    %357 = vector.broadcast %cst_79 : f32 to vector<2x4x32xf32>
    %358 = arith.mulf %357, %356 : vector<2x4x32xf32>
    %cst_80 = arith.constant 1.000000e+00 : f32
    %359 = vector.broadcast %cst_80 : f32 to vector<2x4x32xf32>
    %360 = arith.subf %312, %359 : vector<2x4x32xf32>
    %361 = arith.mulf %360, %360 : vector<2x4x32xf32>
    %cst_81 = arith.constant -2.000000e+00 : f32
    %362 = vector.broadcast %cst_81 : f32 to vector<2x4x32xf32>
    %363 = arith.mulf %362, %361 : vector<2x4x32xf32>
    %364 = arith.maximumf %318, %323 : vector<2x4x32xf32>
    %365 = arith.maximumf %364, %328 : vector<2x4x32xf32>
    %366 = arith.maximumf %365, %333 : vector<2x4x32xf32>
    %367 = arith.maximumf %366, %338 : vector<2x4x32xf32>
    %368 = arith.maximumf %367, %343 : vector<2x4x32xf32>
    %369 = arith.maximumf %368, %348 : vector<2x4x32xf32>
    %370 = arith.maximumf %369, %353 : vector<2x4x32xf32>
    %371 = arith.maximumf %370, %358 : vector<2x4x32xf32>
    %372 = arith.maximumf %371, %363 : vector<2x4x32xf32>
    %cst_82 = arith.constant 0.000000e+00 : f32
    %373 = vector.broadcast %cst_82 : f32 to vector<2x4x32xf32>
    %cst_83 = arith.constant 0.000000e+00 : f32
    %374 = vector.broadcast %cst_83 : f32 to vector<2x4x32xf32>
    %375 = arith.subf %318, %372 : vector<2x4x32xf32>
    %376 = math.exp %375 : vector<2x4x32xf32>
    %377 = arith.addf %374, %376 : vector<2x4x32xf32>
    %378 = vector.extract_strided_slice %313 {offsets = [0, 0], sizes = [1, 32], strides = [1, 1]} : vector<10x32xf32> to vector<1x32xf32>
    %379 = vector.shape_cast %378 : vector<1x32xf32> to vector<32xf32>
    %380 = vector.shape_cast %379 : vector<32xf32> to vector<1x1x32xf32>
    %381 = vector.broadcast %380 : vector<1x1x32xf32> to vector<2x4x32xf32>
    %382 = arith.mulf %376, %381 : vector<2x4x32xf32>
    %383 = arith.addf %373, %382 : vector<2x4x32xf32>
    %384 = arith.subf %323, %372 : vector<2x4x32xf32>
    %385 = math.exp %384 : vector<2x4x32xf32>
    %386 = arith.addf %377, %385 : vector<2x4x32xf32>
    %387 = vector.extract_strided_slice %313 {offsets = [1, 0], sizes = [1, 32], strides = [1, 1]} : vector<10x32xf32> to vector<1x32xf32>
    %388 = vector.shape_cast %387 : vector<1x32xf32> to vector<32xf32>
    %389 = vector.shape_cast %388 : vector<32xf32> to vector<1x1x32xf32>
    %390 = vector.broadcast %389 : vector<1x1x32xf32> to vector<2x4x32xf32>
    %391 = arith.mulf %385, %390 : vector<2x4x32xf32>
    %392 = arith.addf %383, %391 : vector<2x4x32xf32>
    %393 = arith.subf %328, %372 : vector<2x4x32xf32>
    %394 = math.exp %393 : vector<2x4x32xf32>
    %395 = arith.addf %386, %394 : vector<2x4x32xf32>
    %396 = vector.extract_strided_slice %313 {offsets = [2, 0], sizes = [1, 32], strides = [1, 1]} : vector<10x32xf32> to vector<1x32xf32>
    %397 = vector.shape_cast %396 : vector<1x32xf32> to vector<32xf32>
    %398 = vector.shape_cast %397 : vector<32xf32> to vector<1x1x32xf32>
    %399 = vector.broadcast %398 : vector<1x1x32xf32> to vector<2x4x32xf32>
    %400 = arith.mulf %394, %399 : vector<2x4x32xf32>
    %401 = arith.addf %392, %400 : vector<2x4x32xf32>
    %402 = arith.subf %333, %372 : vector<2x4x32xf32>
    %403 = math.exp %402 : vector<2x4x32xf32>
    %404 = arith.addf %395, %403 : vector<2x4x32xf32>
    %405 = vector.extract_strided_slice %313 {offsets = [3, 0], sizes = [1, 32], strides = [1, 1]} : vector<10x32xf32> to vector<1x32xf32>
    %406 = vector.shape_cast %405 : vector<1x32xf32> to vector<32xf32>
    %407 = vector.shape_cast %406 : vector<32xf32> to vector<1x1x32xf32>
    %408 = vector.broadcast %407 : vector<1x1x32xf32> to vector<2x4x32xf32>
    %409 = arith.mulf %403, %408 : vector<2x4x32xf32>
    %410 = arith.addf %401, %409 : vector<2x4x32xf32>
    %411 = arith.subf %338, %372 : vector<2x4x32xf32>
    %412 = math.exp %411 : vector<2x4x32xf32>
    %413 = arith.addf %404, %412 : vector<2x4x32xf32>
    %414 = vector.extract_strided_slice %313 {offsets = [4, 0], sizes = [1, 32], strides = [1, 1]} : vector<10x32xf32> to vector<1x32xf32>
    %415 = vector.shape_cast %414 : vector<1x32xf32> to vector<32xf32>
    %416 = vector.shape_cast %415 : vector<32xf32> to vector<1x1x32xf32>
    %417 = vector.broadcast %416 : vector<1x1x32xf32> to vector<2x4x32xf32>
    %418 = arith.mulf %412, %417 : vector<2x4x32xf32>
    %419 = arith.addf %410, %418 : vector<2x4x32xf32>
    %420 = arith.subf %343, %372 : vector<2x4x32xf32>
    %421 = math.exp %420 : vector<2x4x32xf32>
    %422 = arith.addf %413, %421 : vector<2x4x32xf32>
    %423 = vector.extract_strided_slice %313 {offsets = [5, 0], sizes = [1, 32], strides = [1, 1]} : vector<10x32xf32> to vector<1x32xf32>
    %424 = vector.shape_cast %423 : vector<1x32xf32> to vector<32xf32>
    %425 = vector.shape_cast %424 : vector<32xf32> to vector<1x1x32xf32>
    %426 = vector.broadcast %425 : vector<1x1x32xf32> to vector<2x4x32xf32>
    %427 = arith.mulf %421, %426 : vector<2x4x32xf32>
    %428 = arith.addf %419, %427 : vector<2x4x32xf32>
    %429 = arith.subf %348, %372 : vector<2x4x32xf32>
    %430 = math.exp %429 : vector<2x4x32xf32>
    %431 = arith.addf %422, %430 : vector<2x4x32xf32>
    %432 = vector.extract_strided_slice %313 {offsets = [6, 0], sizes = [1, 32], strides = [1, 1]} : vector<10x32xf32> to vector<1x32xf32>
    %433 = vector.shape_cast %432 : vector<1x32xf32> to vector<32xf32>
    %434 = vector.shape_cast %433 : vector<32xf32> to vector<1x1x32xf32>
    %435 = vector.broadcast %434 : vector<1x1x32xf32> to vector<2x4x32xf32>
    %436 = arith.mulf %430, %435 : vector<2x4x32xf32>
    %437 = arith.addf %428, %436 : vector<2x4x32xf32>
    %438 = arith.subf %353, %372 : vector<2x4x32xf32>
    %439 = math.exp %438 : vector<2x4x32xf32>
    %440 = arith.addf %431, %439 : vector<2x4x32xf32>
    %441 = vector.extract_strided_slice %313 {offsets = [7, 0], sizes = [1, 32], strides = [1, 1]} : vector<10x32xf32> to vector<1x32xf32>
    %442 = vector.shape_cast %441 : vector<1x32xf32> to vector<32xf32>
    %443 = vector.shape_cast %442 : vector<32xf32> to vector<1x1x32xf32>
    %444 = vector.broadcast %443 : vector<1x1x32xf32> to vector<2x4x32xf32>
    %445 = arith.mulf %439, %444 : vector<2x4x32xf32>
    %446 = arith.addf %437, %445 : vector<2x4x32xf32>
    %447 = arith.subf %358, %372 : vector<2x4x32xf32>
    %448 = math.exp %447 : vector<2x4x32xf32>
    %449 = arith.addf %440, %448 : vector<2x4x32xf32>
    %450 = vector.extract_strided_slice %313 {offsets = [8, 0], sizes = [1, 32], strides = [1, 1]} : vector<10x32xf32> to vector<1x32xf32>
    %451 = vector.shape_cast %450 : vector<1x32xf32> to vector<32xf32>
    %452 = vector.shape_cast %451 : vector<32xf32> to vector<1x1x32xf32>
    %453 = vector.broadcast %452 : vector<1x1x32xf32> to vector<2x4x32xf32>
    %454 = arith.mulf %448, %453 : vector<2x4x32xf32>
    %455 = arith.addf %446, %454 : vector<2x4x32xf32>
    %456 = arith.subf %363, %372 : vector<2x4x32xf32>
    %457 = math.exp %456 : vector<2x4x32xf32>
    %458 = arith.addf %449, %457 : vector<2x4x32xf32>
    %459 = vector.extract_strided_slice %313 {offsets = [9, 0], sizes = [1, 32], strides = [1, 1]} : vector<10x32xf32> to vector<1x32xf32>
    %460 = vector.shape_cast %459 : vector<1x32xf32> to vector<32xf32>
    %461 = vector.shape_cast %460 : vector<32xf32> to vector<1x1x32xf32>
    %462 = vector.broadcast %461 : vector<1x1x32xf32> to vector<2x4x32xf32>
    %463 = arith.mulf %457, %462 : vector<2x4x32xf32>
    %464 = arith.addf %455, %463 : vector<2x4x32xf32>
    %465 = arith.divf %464, %458 : vector<2x4x32xf32>
    %cst_84 = arith.constant dense<0.000000e+00> : vector<2x32xf32>
    %466 = vector.multi_reduction <add>, %465, %cst_84 [1] : vector<2x4x32xf32> to vector<2x32xf32>
    %c0_85 = arith.constant 0 : index
    %c64 = arith.constant 64 : index
    %467 = vector.load %arg11[%c0_85, %c64] : memref<2x128xf32, #tpu.memory_space<vmem>>, vector<2x32xf32>
    tpu.vector_store %arg11[%c0_85, %c64], %466 {strides = array<i32>} : memref<2x128xf32, #tpu.memory_space<vmem>>, vector<2x32xf32>,
    %c0_86 = arith.constant 0 : index
    %c0_87 = arith.constant 0 : index
    %c0_88 = arith.constant 0 : index
    %468 = vector.load %arg4[%c0_86, %c0_87, %c0_88] : memref<2x2x32xf32, #tpu.memory_space<vmem>>, vector<2x2x32xf32>
    %c0_89 = arith.constant 0 : index
    %c0_90 = arith.constant 0 : index
    %469 = vector.load %arg8[%c0_89, %c0_90] : memref<10x32xf32, #tpu.memory_space<vmem>>, vector<10x32xf32>
    %cst_91 = arith.constant -1.000000e+00 : f32
    %470 = vector.broadcast %cst_91 : f32 to vector<2x2x32xf32>
    %471 = arith.subf %468, %470 : vector<2x2x32xf32>
    %472 = arith.mulf %471, %471 : vector<2x2x32xf32>
    %cst_92 = arith.constant -2.000000e+00 : f32
    %473 = vector.broadcast %cst_92 : f32 to vector<2x2x32xf32>
    %474 = arith.mulf %473, %472 : vector<2x2x32xf32>
    %cst_93 = arith.constant -0.777777791 : f32
    %475 = vector.broadcast %cst_93 : f32 to vector<2x2x32xf32>
    %476 = arith.subf %468, %475 : vector<2x2x32xf32>
    %477 = arith.mulf %476, %476 : vector<2x2x32xf32>
    %cst_94 = arith.constant -2.000000e+00 : f32
    %478 = vector.broadcast %cst_94 : f32 to vector<2x2x32xf32>
    %479 = arith.mulf %478, %477 : vector<2x2x32xf32>
    %cst_95 = arith.constant -0.555555582 : f32
    %480 = vector.broadcast %cst_95 : f32 to vector<2x2x32xf32>
    %481 = arith.subf %468, %480 : vector<2x2x32xf32>
    %482 = arith.mulf %481, %481 : vector<2x2x32xf32>
    %cst_96 = arith.constant -2.000000e+00 : f32
    %483 = vector.broadcast %cst_96 : f32 to vector<2x2x32xf32>
    %484 = arith.mulf %483, %482 : vector<2x2x32xf32>
    %cst_97 = arith.constant -0.333333343 : f32
    %485 = vector.broadcast %cst_97 : f32 to vector<2x2x32xf32>
    %486 = arith.subf %468, %485 : vector<2x2x32xf32>
    %487 = arith.mulf %486, %486 : vector<2x2x32xf32>
    %cst_98 = arith.constant -2.000000e+00 : f32
    %488 = vector.broadcast %cst_98 : f32 to vector<2x2x32xf32>
    %489 = arith.mulf %488, %487 : vector<2x2x32xf32>
    %cst_99 = arith.constant -0.111111112 : f32
    %490 = vector.broadcast %cst_99 : f32 to vector<2x2x32xf32>
    %491 = arith.subf %468, %490 : vector<2x2x32xf32>
    %492 = arith.mulf %491, %491 : vector<2x2x32xf32>
    %cst_100 = arith.constant -2.000000e+00 : f32
    %493 = vector.broadcast %cst_100 : f32 to vector<2x2x32xf32>
    %494 = arith.mulf %493, %492 : vector<2x2x32xf32>
    %cst_101 = arith.constant 0.111111112 : f32
    %495 = vector.broadcast %cst_101 : f32 to vector<2x2x32xf32>
    %496 = arith.subf %468, %495 : vector<2x2x32xf32>
    %497 = arith.mulf %496, %496 : vector<2x2x32xf32>
    %cst_102 = arith.constant -2.000000e+00 : f32
    %498 = vector.broadcast %cst_102 : f32 to vector<2x2x32xf32>
    %499 = arith.mulf %498, %497 : vector<2x2x32xf32>
    %cst_103 = arith.constant 0.333333343 : f32
    %500 = vector.broadcast %cst_103 : f32 to vector<2x2x32xf32>
    %501 = arith.subf %468, %500 : vector<2x2x32xf32>
    %502 = arith.mulf %501, %501 : vector<2x2x32xf32>
    %cst_104 = arith.constant -2.000000e+00 : f32
    %503 = vector.broadcast %cst_104 : f32 to vector<2x2x32xf32>
    %504 = arith.mulf %503, %502 : vector<2x2x32xf32>
    %cst_105 = arith.constant 0.555555582 : f32
    %505 = vector.broadcast %cst_105 : f32 to vector<2x2x32xf32>
    %506 = arith.subf %468, %505 : vector<2x2x32xf32>
    %507 = arith.mulf %506, %506 : vector<2x2x32xf32>
    %cst_106 = arith.constant -2.000000e+00 : f32
    %508 = vector.broadcast %cst_106 : f32 to vector<2x2x32xf32>
    %509 = arith.mulf %508, %507 : vector<2x2x32xf32>
    %cst_107 = arith.constant 0.777777791 : f32
    %510 = vector.broadcast %cst_107 : f32 to vector<2x2x32xf32>
    %511 = arith.subf %468, %510 : vector<2x2x32xf32>
    %512 = arith.mulf %511, %511 : vector<2x2x32xf32>
    %cst_108 = arith.constant -2.000000e+00 : f32
    %513 = vector.broadcast %cst_108 : f32 to vector<2x2x32xf32>
    %514 = arith.mulf %513, %512 : vector<2x2x32xf32>
    %cst_109 = arith.constant 1.000000e+00 : f32
    %515 = vector.broadcast %cst_109 : f32 to vector<2x2x32xf32>
    %516 = arith.subf %468, %515 : vector<2x2x32xf32>
    %517 = arith.mulf %516, %516 : vector<2x2x32xf32>
    %cst_110 = arith.constant -2.000000e+00 : f32
    %518 = vector.broadcast %cst_110 : f32 to vector<2x2x32xf32>
    %519 = arith.mulf %518, %517 : vector<2x2x32xf32>
    %520 = arith.maximumf %474, %479 : vector<2x2x32xf32>
    %521 = arith.maximumf %520, %484 : vector<2x2x32xf32>
    %522 = arith.maximumf %521, %489 : vector<2x2x32xf32>
    %523 = arith.maximumf %522, %494 : vector<2x2x32xf32>
    %524 = arith.maximumf %523, %499 : vector<2x2x32xf32>
    %525 = arith.maximumf %524, %504 : vector<2x2x32xf32>
    %526 = arith.maximumf %525, %509 : vector<2x2x32xf32>
    %527 = arith.maximumf %526, %514 : vector<2x2x32xf32>
    %528 = arith.maximumf %527, %519 : vector<2x2x32xf32>
    %cst_111 = arith.constant 0.000000e+00 : f32
    %529 = vector.broadcast %cst_111 : f32 to vector<2x2x32xf32>
    %cst_112 = arith.constant 0.000000e+00 : f32
    %530 = vector.broadcast %cst_112 : f32 to vector<2x2x32xf32>
    %531 = arith.subf %474, %528 : vector<2x2x32xf32>
    %532 = math.exp %531 : vector<2x2x32xf32>
    %533 = arith.addf %530, %532 : vector<2x2x32xf32>
    %534 = vector.extract_strided_slice %469 {offsets = [0, 0], sizes = [1, 32], strides = [1, 1]} : vector<10x32xf32> to vector<1x32xf32>
    %535 = vector.shape_cast %534 : vector<1x32xf32> to vector<32xf32>
    %536 = vector.shape_cast %535 : vector<32xf32> to vector<1x1x32xf32>
    %537 = vector.broadcast %536 : vector<1x1x32xf32> to vector<2x2x32xf32>
    %538 = arith.mulf %532, %537 : vector<2x2x32xf32>
    %539 = arith.addf %529, %538 : vector<2x2x32xf32>
    %540 = arith.subf %479, %528 : vector<2x2x32xf32>
    %541 = math.exp %540 : vector<2x2x32xf32>
    %542 = arith.addf %533, %541 : vector<2x2x32xf32>
    %543 = vector.extract_strided_slice %469 {offsets = [1, 0], sizes = [1, 32], strides = [1, 1]} : vector<10x32xf32> to vector<1x32xf32>
    %544 = vector.shape_cast %543 : vector<1x32xf32> to vector<32xf32>
    %545 = vector.shape_cast %544 : vector<32xf32> to vector<1x1x32xf32>
    %546 = vector.broadcast %545 : vector<1x1x32xf32> to vector<2x2x32xf32>
    %547 = arith.mulf %541, %546 : vector<2x2x32xf32>
    %548 = arith.addf %539, %547 : vector<2x2x32xf32>
    %549 = arith.subf %484, %528 : vector<2x2x32xf32>
    %550 = math.exp %549 : vector<2x2x32xf32>
    %551 = arith.addf %542, %550 : vector<2x2x32xf32>
    %552 = vector.extract_strided_slice %469 {offsets = [2, 0], sizes = [1, 32], strides = [1, 1]} : vector<10x32xf32> to vector<1x32xf32>
    %553 = vector.shape_cast %552 : vector<1x32xf32> to vector<32xf32>
    %554 = vector.shape_cast %553 : vector<32xf32> to vector<1x1x32xf32>
    %555 = vector.broadcast %554 : vector<1x1x32xf32> to vector<2x2x32xf32>
    %556 = arith.mulf %550, %555 : vector<2x2x32xf32>
    %557 = arith.addf %548, %556 : vector<2x2x32xf32>
    %558 = arith.subf %489, %528 : vector<2x2x32xf32>
    %559 = math.exp %558 : vector<2x2x32xf32>
    %560 = arith.addf %551, %559 : vector<2x2x32xf32>
    %561 = vector.extract_strided_slice %469 {offsets = [3, 0], sizes = [1, 32], strides = [1, 1]} : vector<10x32xf32> to vector<1x32xf32>
    %562 = vector.shape_cast %561 : vector<1x32xf32> to vector<32xf32>
    %563 = vector.shape_cast %562 : vector<32xf32> to vector<1x1x32xf32>
    %564 = vector.broadcast %563 : vector<1x1x32xf32> to vector<2x2x32xf32>
    %565 = arith.mulf %559, %564 : vector<2x2x32xf32>
    %566 = arith.addf %557, %565 : vector<2x2x32xf32>
    %567 = arith.subf %494, %528 : vector<2x2x32xf32>
    %568 = math.exp %567 : vector<2x2x32xf32>
    %569 = arith.addf %560, %568 : vector<2x2x32xf32>
    %570 = vector.extract_strided_slice %469 {offsets = [4, 0], sizes = [1, 32], strides = [1, 1]} : vector<10x32xf32> to vector<1x32xf32>
    %571 = vector.shape_cast %570 : vector<1x32xf32> to vector<32xf32>
    %572 = vector.shape_cast %571 : vector<32xf32> to vector<1x1x32xf32>
    %573 = vector.broadcast %572 : vector<1x1x32xf32> to vector<2x2x32xf32>
    %574 = arith.mulf %568, %573 : vector<2x2x32xf32>
    %575 = arith.addf %566, %574 : vector<2x2x32xf32>
    %576 = arith.subf %499, %528 : vector<2x2x32xf32>
    %577 = math.exp %576 : vector<2x2x32xf32>
    %578 = arith.addf %569, %577 : vector<2x2x32xf32>
    %579 = vector.extract_strided_slice %469 {offsets = [5, 0], sizes = [1, 32], strides = [1, 1]} : vector<10x32xf32> to vector<1x32xf32>
    %580 = vector.shape_cast %579 : vector<1x32xf32> to vector<32xf32>
    %581 = vector.shape_cast %580 : vector<32xf32> to vector<1x1x32xf32>
    %582 = vector.broadcast %581 : vector<1x1x32xf32> to vector<2x2x32xf32>
    %583 = arith.mulf %577, %582 : vector<2x2x32xf32>
    %584 = arith.addf %575, %583 : vector<2x2x32xf32>
    %585 = arith.subf %504, %528 : vector<2x2x32xf32>
    %586 = math.exp %585 : vector<2x2x32xf32>
    %587 = arith.addf %578, %586 : vector<2x2x32xf32>
    %588 = vector.extract_strided_slice %469 {offsets = [6, 0], sizes = [1, 32], strides = [1, 1]} : vector<10x32xf32> to vector<1x32xf32>
    %589 = vector.shape_cast %588 : vector<1x32xf32> to vector<32xf32>
    %590 = vector.shape_cast %589 : vector<32xf32> to vector<1x1x32xf32>
    %591 = vector.broadcast %590 : vector<1x1x32xf32> to vector<2x2x32xf32>
    %592 = arith.mulf %586, %591 : vector<2x2x32xf32>
    %593 = arith.addf %584, %592 : vector<2x2x32xf32>
    %594 = arith.subf %509, %528 : vector<2x2x32xf32>
    %595 = math.exp %594 : vector<2x2x32xf32>
    %596 = arith.addf %587, %595 : vector<2x2x32xf32>
    %597 = vector.extract_strided_slice %469 {offsets = [7, 0], sizes = [1, 32], strides = [1, 1]} : vector<10x32xf32> to vector<1x32xf32>
    %598 = vector.shape_cast %597 : vector<1x32xf32> to vector<32xf32>
    %599 = vector.shape_cast %598 : vector<32xf32> to vector<1x1x32xf32>
    %600 = vector.broadcast %599 : vector<1x1x32xf32> to vector<2x2x32xf32>
    %601 = arith.mulf %595, %600 : vector<2x2x32xf32>
    %602 = arith.addf %593, %601 : vector<2x2x32xf32>
    %603 = arith.subf %514, %528 : vector<2x2x32xf32>
    %604 = math.exp %603 : vector<2x2x32xf32>
    %605 = arith.addf %596, %604 : vector<2x2x32xf32>
    %606 = vector.extract_strided_slice %469 {offsets = [8, 0], sizes = [1, 32], strides = [1, 1]} : vector<10x32xf32> to vector<1x32xf32>
    %607 = vector.shape_cast %606 : vector<1x32xf32> to vector<32xf32>
    %608 = vector.shape_cast %607 : vector<32xf32> to vector<1x1x32xf32>
    %609 = vector.broadcast %608 : vector<1x1x32xf32> to vector<2x2x32xf32>
    %610 = arith.mulf %604, %609 : vector<2x2x32xf32>
    %611 = arith.addf %602, %610 : vector<2x2x32xf32>
    %612 = arith.subf %519, %528 : vector<2x2x32xf32>
    %613 = math.exp %612 : vector<2x2x32xf32>
    %614 = arith.addf %605, %613 : vector<2x2x32xf32>
    %615 = vector.extract_strided_slice %469 {offsets = [9, 0], sizes = [1, 32], strides = [1, 1]} : vector<10x32xf32> to vector<1x32xf32>
    %616 = vector.shape_cast %615 : vector<1x32xf32> to vector<32xf32>
    %617 = vector.shape_cast %616 : vector<32xf32> to vector<1x1x32xf32>
    %618 = vector.broadcast %617 : vector<1x1x32xf32> to vector<2x2x32xf32>
    %619 = arith.mulf %613, %618 : vector<2x2x32xf32>
    %620 = arith.addf %611, %619 : vector<2x2x32xf32>
    %621 = arith.divf %620, %614 : vector<2x2x32xf32>
    %cst_113 = arith.constant dense<0.000000e+00> : vector<2x32xf32>
    %622 = vector.multi_reduction <add>, %621, %cst_113 [1] : vector<2x2x32xf32> to vector<2x32xf32>
    %c0_114 = arith.constant 0 : index
    %c96 = arith.constant 96 : index
    %623 = vector.load %arg11[%c0_114, %c96] : memref<2x128xf32, #tpu.memory_space<vmem>>, vector<2x32xf32>
    tpu.vector_store %arg11[%c0_114, %c96], %622 {strides = array<i32>} : memref<2x128xf32, #tpu.memory_space<vmem>>, vector<2x32xf32>,
    %c0_115 = arith.constant 0 : index
    %c0_116 = arith.constant 0 : index
    %624 = vector.load %arg11[%c0_115, %c0_116] : memref<2x128xf32, #tpu.memory_space<vmem>>, vector<2x128xf32>
    %c0_117 = arith.constant 0 : index
    %c0_118 = arith.constant 0 : index
    %625 = vector.load %arg9[%c0_117, %c0_118] : memref<10x128xf32, #tpu.memory_space<vmem>>, vector<10x128xf32>
    %cst_119 = arith.constant -1.000000e+00 : f32
    %626 = vector.broadcast %cst_119 : f32 to vector<2x128xf32>
    %627 = arith.subf %624, %626 : vector<2x128xf32>
    %628 = arith.mulf %627, %627 : vector<2x128xf32>
    %cst_120 = arith.constant -2.000000e+00 : f32
    %629 = vector.broadcast %cst_120 : f32 to vector<2x128xf32>
    %630 = arith.mulf %629, %628 : vector<2x128xf32>
    %cst_121 = arith.constant -0.777777791 : f32
    %631 = vector.broadcast %cst_121 : f32 to vector<2x128xf32>
    %632 = arith.subf %624, %631 : vector<2x128xf32>
    %633 = arith.mulf %632, %632 : vector<2x128xf32>
    %cst_122 = arith.constant -2.000000e+00 : f32
    %634 = vector.broadcast %cst_122 : f32 to vector<2x128xf32>
    %635 = arith.mulf %634, %633 : vector<2x128xf32>
    %cst_123 = arith.constant -0.555555582 : f32
    %636 = vector.broadcast %cst_123 : f32 to vector<2x128xf32>
    %637 = arith.subf %624, %636 : vector<2x128xf32>
    %638 = arith.mulf %637, %637 : vector<2x128xf32>
    %cst_124 = arith.constant -2.000000e+00 : f32
    %639 = vector.broadcast %cst_124 : f32 to vector<2x128xf32>
    %640 = arith.mulf %639, %638 : vector<2x128xf32>
    %cst_125 = arith.constant -0.333333343 : f32
    %641 = vector.broadcast %cst_125 : f32 to vector<2x128xf32>
    %642 = arith.subf %624, %641 : vector<2x128xf32>
    %643 = arith.mulf %642, %642 : vector<2x128xf32>
    %cst_126 = arith.constant -2.000000e+00 : f32
    %644 = vector.broadcast %cst_126 : f32 to vector<2x128xf32>
    %645 = arith.mulf %644, %643 : vector<2x128xf32>
    %cst_127 = arith.constant -0.111111112 : f32
    %646 = vector.broadcast %cst_127 : f32 to vector<2x128xf32>
    %647 = arith.subf %624, %646 : vector<2x128xf32>
    %648 = arith.mulf %647, %647 : vector<2x128xf32>
    %cst_128 = arith.constant -2.000000e+00 : f32
    %649 = vector.broadcast %cst_128 : f32 to vector<2x128xf32>
    %650 = arith.mulf %649, %648 : vector<2x128xf32>
    %cst_129 = arith.constant 0.111111112 : f32
    %651 = vector.broadcast %cst_129 : f32 to vector<2x128xf32>
    %652 = arith.subf %624, %651 : vector<2x128xf32>
    %653 = arith.mulf %652, %652 : vector<2x128xf32>
    %cst_130 = arith.constant -2.000000e+00 : f32
    %654 = vector.broadcast %cst_130 : f32 to vector<2x128xf32>
    %655 = arith.mulf %654, %653 : vector<2x128xf32>
    %cst_131 = arith.constant 0.333333343 : f32
    %656 = vector.broadcast %cst_131 : f32 to vector<2x128xf32>
    %657 = arith.subf %624, %656 : vector<2x128xf32>
    %658 = arith.mulf %657, %657 : vector<2x128xf32>
    %cst_132 = arith.constant -2.000000e+00 : f32
    %659 = vector.broadcast %cst_132 : f32 to vector<2x128xf32>
    %660 = arith.mulf %659, %658 : vector<2x128xf32>
    %cst_133 = arith.constant 0.555555582 : f32
    %661 = vector.broadcast %cst_133 : f32 to vector<2x128xf32>
    %662 = arith.subf %624, %661 : vector<2x128xf32>
    %663 = arith.mulf %662, %662 : vector<2x128xf32>
    %cst_134 = arith.constant -2.000000e+00 : f32
    %664 = vector.broadcast %cst_134 : f32 to vector<2x128xf32>
    %665 = arith.mulf %664, %663 : vector<2x128xf32>
    %cst_135 = arith.constant 0.777777791 : f32
    %666 = vector.broadcast %cst_135 : f32 to vector<2x128xf32>
    %667 = arith.subf %624, %666 : vector<2x128xf32>
    %668 = arith.mulf %667, %667 : vector<2x128xf32>
    %cst_136 = arith.constant -2.000000e+00 : f32
    %669 = vector.broadcast %cst_136 : f32 to vector<2x128xf32>
    %670 = arith.mulf %669, %668 : vector<2x128xf32>
    %cst_137 = arith.constant 1.000000e+00 : f32
    %671 = vector.broadcast %cst_137 : f32 to vector<2x128xf32>
    %672 = arith.subf %624, %671 : vector<2x128xf32>
    %673 = arith.mulf %672, %672 : vector<2x128xf32>
    %cst_138 = arith.constant -2.000000e+00 : f32
    %674 = vector.broadcast %cst_138 : f32 to vector<2x128xf32>
    %675 = arith.mulf %674, %673 : vector<2x128xf32>
    %676 = arith.maximumf %630, %635 : vector<2x128xf32>
    %677 = arith.maximumf %676, %640 : vector<2x128xf32>
    %678 = arith.maximumf %677, %645 : vector<2x128xf32>
    %679 = arith.maximumf %678, %650 : vector<2x128xf32>
    %680 = arith.maximumf %679, %655 : vector<2x128xf32>
    %681 = arith.maximumf %680, %660 : vector<2x128xf32>
    %682 = arith.maximumf %681, %665 : vector<2x128xf32>
    %683 = arith.maximumf %682, %670 : vector<2x128xf32>
    %684 = arith.maximumf %683, %675 : vector<2x128xf32>
    %cst_139 = arith.constant 0.000000e+00 : f32
    %685 = vector.broadcast %cst_139 : f32 to vector<2x128xf32>
    %cst_140 = arith.constant 0.000000e+00 : f32
    %686 = vector.broadcast %cst_140 : f32 to vector<2x128xf32>
    %687 = arith.subf %630, %684 : vector<2x128xf32>
    %688 = math.exp %687 : vector<2x128xf32>
    %689 = arith.addf %686, %688 : vector<2x128xf32>
    %690 = vector.extract_strided_slice %625 {offsets = [0, 0], sizes = [1, 128], strides = [1, 1]} : vector<10x128xf32> to vector<1x128xf32>
    %691 = vector.shape_cast %690 : vector<1x128xf32> to vector<128xf32>
    %692 = vector.shape_cast %691 : vector<128xf32> to vector<1x128xf32>
    %693 = vector.broadcast %692 : vector<1x128xf32> to vector<2x128xf32>
    %694 = arith.mulf %688, %693 : vector<2x128xf32>
    %695 = arith.addf %685, %694 : vector<2x128xf32>
    %696 = arith.subf %635, %684 : vector<2x128xf32>
    %697 = math.exp %696 : vector<2x128xf32>
    %698 = arith.addf %689, %697 : vector<2x128xf32>
    %699 = vector.extract_strided_slice %625 {offsets = [1, 0], sizes = [1, 128], strides = [1, 1]} : vector<10x128xf32> to vector<1x128xf32>
    %700 = vector.shape_cast %699 : vector<1x128xf32> to vector<128xf32>
    %701 = vector.shape_cast %700 : vector<128xf32> to vector<1x128xf32>
    %702 = vector.broadcast %701 : vector<1x128xf32> to vector<2x128xf32>
    %703 = arith.mulf %697, %702 : vector<2x128xf32>
    %704 = arith.addf %695, %703 : vector<2x128xf32>
    %705 = arith.subf %640, %684 : vector<2x128xf32>
    %706 = math.exp %705 : vector<2x128xf32>
    %707 = arith.addf %698, %706 : vector<2x128xf32>
    %708 = vector.extract_strided_slice %625 {offsets = [2, 0], sizes = [1, 128], strides = [1, 1]} : vector<10x128xf32> to vector<1x128xf32>
    %709 = vector.shape_cast %708 : vector<1x128xf32> to vector<128xf32>
    %710 = vector.shape_cast %709 : vector<128xf32> to vector<1x128xf32>
    %711 = vector.broadcast %710 : vector<1x128xf32> to vector<2x128xf32>
    %712 = arith.mulf %706, %711 : vector<2x128xf32>
    %713 = arith.addf %704, %712 : vector<2x128xf32>
    %714 = arith.subf %645, %684 : vector<2x128xf32>
    %715 = math.exp %714 : vector<2x128xf32>
    %716 = arith.addf %707, %715 : vector<2x128xf32>
    %717 = vector.extract_strided_slice %625 {offsets = [3, 0], sizes = [1, 128], strides = [1, 1]} : vector<10x128xf32> to vector<1x128xf32>
    %718 = vector.shape_cast %717 : vector<1x128xf32> to vector<128xf32>
    %719 = vector.shape_cast %718 : vector<128xf32> to vector<1x128xf32>
    %720 = vector.broadcast %719 : vector<1x128xf32> to vector<2x128xf32>
    %721 = arith.mulf %715, %720 : vector<2x128xf32>
    %722 = arith.addf %713, %721 : vector<2x128xf32>
    %723 = arith.subf %650, %684 : vector<2x128xf32>
    %724 = math.exp %723 : vector<2x128xf32>
    %725 = arith.addf %716, %724 : vector<2x128xf32>
    %726 = vector.extract_strided_slice %625 {offsets = [4, 0], sizes = [1, 128], strides = [1, 1]} : vector<10x128xf32> to vector<1x128xf32>
    %727 = vector.shape_cast %726 : vector<1x128xf32> to vector<128xf32>
    %728 = vector.shape_cast %727 : vector<128xf32> to vector<1x128xf32>
    %729 = vector.broadcast %728 : vector<1x128xf32> to vector<2x128xf32>
    %730 = arith.mulf %724, %729 : vector<2x128xf32>
    %731 = arith.addf %722, %730 : vector<2x128xf32>
    %732 = arith.subf %655, %684 : vector<2x128xf32>
    %733 = math.exp %732 : vector<2x128xf32>
    %734 = arith.addf %725, %733 : vector<2x128xf32>
    %735 = vector.extract_strided_slice %625 {offsets = [5, 0], sizes = [1, 128], strides = [1, 1]} : vector<10x128xf32> to vector<1x128xf32>
    %736 = vector.shape_cast %735 : vector<1x128xf32> to vector<128xf32>
    %737 = vector.shape_cast %736 : vector<128xf32> to vector<1x128xf32>
    %738 = vector.broadcast %737 : vector<1x128xf32> to vector<2x128xf32>
    %739 = arith.mulf %733, %738 : vector<2x128xf32>
    %740 = arith.addf %731, %739 : vector<2x128xf32>
    %741 = arith.subf %660, %684 : vector<2x128xf32>
    %742 = math.exp %741 : vector<2x128xf32>
    %743 = arith.addf %734, %742 : vector<2x128xf32>
    %744 = vector.extract_strided_slice %625 {offsets = [6, 0], sizes = [1, 128], strides = [1, 1]} : vector<10x128xf32> to vector<1x128xf32>
    %745 = vector.shape_cast %744 : vector<1x128xf32> to vector<128xf32>
    %746 = vector.shape_cast %745 : vector<128xf32> to vector<1x128xf32>
    %747 = vector.broadcast %746 : vector<1x128xf32> to vector<2x128xf32>
    %748 = arith.mulf %742, %747 : vector<2x128xf32>
    %749 = arith.addf %740, %748 : vector<2x128xf32>
    %750 = arith.subf %665, %684 : vector<2x128xf32>
    %751 = math.exp %750 : vector<2x128xf32>
    %752 = arith.addf %743, %751 : vector<2x128xf32>
    %753 = vector.extract_strided_slice %625 {offsets = [7, 0], sizes = [1, 128], strides = [1, 1]} : vector<10x128xf32> to vector<1x128xf32>
    %754 = vector.shape_cast %753 : vector<1x128xf32> to vector<128xf32>
    %755 = vector.shape_cast %754 : vector<128xf32> to vector<1x128xf32>
    %756 = vector.broadcast %755 : vector<1x128xf32> to vector<2x128xf32>
    %757 = arith.mulf %751, %756 : vector<2x128xf32>
    %758 = arith.addf %749, %757 : vector<2x128xf32>
    %759 = arith.subf %670, %684 : vector<2x128xf32>
    %760 = math.exp %759 : vector<2x128xf32>
    %761 = arith.addf %752, %760 : vector<2x128xf32>
    %762 = vector.extract_strided_slice %625 {offsets = [8, 0], sizes = [1, 128], strides = [1, 1]} : vector<10x128xf32> to vector<1x128xf32>
    %763 = vector.shape_cast %762 : vector<1x128xf32> to vector<128xf32>
    %764 = vector.shape_cast %763 : vector<128xf32> to vector<1x128xf32>
    %765 = vector.broadcast %764 : vector<1x128xf32> to vector<2x128xf32>
    %766 = arith.mulf %760, %765 : vector<2x128xf32>
    %767 = arith.addf %758, %766 : vector<2x128xf32>
    %768 = arith.subf %675, %684 : vector<2x128xf32>
    %769 = math.exp %768 : vector<2x128xf32>
    %770 = arith.addf %761, %769 : vector<2x128xf32>
    %771 = vector.extract_strided_slice %625 {offsets = [9, 0], sizes = [1, 128], strides = [1, 1]} : vector<10x128xf32> to vector<1x128xf32>
    %772 = vector.shape_cast %771 : vector<1x128xf32> to vector<128xf32>
    %773 = vector.shape_cast %772 : vector<128xf32> to vector<1x128xf32>
    %774 = vector.broadcast %773 : vector<1x128xf32> to vector<2x128xf32>
    %775 = arith.mulf %769, %774 : vector<2x128xf32>
    %776 = arith.addf %767, %775 : vector<2x128xf32>
    %777 = arith.divf %776, %770 : vector<2x128xf32>
    %cst_141 = arith.constant dense<0.000000e+00> : vector<2xf32>
    %778 = vector.multi_reduction <add>, %777, %cst_141 [1] : vector<2x128xf32> to vector<2xf32>
    %779 = vector.shape_cast %778 : vector<2xf32> to vector<2x1xf32>
    %c0_142 = arith.constant 0 : index
    %c0_143 = arith.constant 0 : index
    %780 = vector.load %arg10[%c0_142, %c0_143] : memref<2x1xf32, #tpu.memory_space<vmem>>, vector<2x1xf32>
    tpu.vector_store %arg10[%c0_142, %c0_143], %779 {strides = array<i32>} : memref<2x1xf32, #tpu.memory_space<vmem>>, vector<2x1xf32>,
    return
  }
  func.func @transform_0(%arg0: i32) -> (i32, i32, i32) {
    %c0_i32 = arith.constant 0 : i32
    %c0_i32_0 = arith.constant 0 : i32
    %c0_i32_1 = arith.constant 0 : i32
    return %arg0, %c0_i32, %c0_i32_0 : i32, i32, i32
  }
  func.func @transform_1(%arg0: i32) -> (i32, i32, i32) {
    %c0_i32 = arith.constant 0 : i32
    %c0_i32_0 = arith.constant 0 : i32
    %c0_i32_1 = arith.constant 0 : i32
    return %arg0, %c0_i32, %c0_i32_0 : i32, i32, i32
  }
  func.func @transform_2(%arg0: i32) -> (i32, i32, i32) {
    %c0_i32 = arith.constant 0 : i32
    %c0_i32_0 = arith.constant 0 : i32
    %c0_i32_1 = arith.constant 0 : i32
    return %arg0, %c0_i32, %c0_i32_0 : i32, i32, i32
  }
  func.func @transform_3(%arg0: i32) -> (i32, i32, i32) {
    %c0_i32 = arith.constant 0 : i32
    %c0_i32_0 = arith.constant 0 : i32
    %c0_i32_1 = arith.constant 0 : i32
    return %arg0, %c0_i32, %c0_i32_0 : i32, i32, i32
  }
  func.func @transform_4(%arg0: i32) -> (i32, i32) {
    %c0_i32 = arith.constant 0 : i32
    %c0_i32_0 = arith.constant 0 : i32
    %c0_i32_1 = arith.constant 0 : i32
    return %c0_i32, %c0_i32_0 : i32, i32
  }
  func.func @transform_5(%arg0: i32) -> (i32, i32) {
    %c0_i32 = arith.constant 0 : i32
    %c0_i32_0 = arith.constant 0 : i32
    %c0_i32_1 = arith.constant 0 : i32
    return %c0_i32, %c0_i32_0 : i32, i32
  }
  func.func @transform_6(%arg0: i32) -> (i32, i32) {
    %c0_i32 = arith.constant 0 : i32
    %c0_i32_0 = arith.constant 0 : i32
    %c0_i32_1 = arith.constant 0 : i32
    return %c0_i32, %c0_i32_0 : i32, i32
  }
  func.func @transform_7(%arg0: i32) -> (i32, i32) {
    %c0_i32 = arith.constant 0 : i32
    %c0_i32_0 = arith.constant 0 : i32
    %c0_i32_1 = arith.constant 0 : i32
    return %c0_i32, %c0_i32_0 : i32, i32
  }
  func.func @transform_8(%arg0: i32) -> (i32, i32) {
    %c0_i32 = arith.constant 0 : i32
    %c0_i32_0 = arith.constant 0 : i32
    %c0_i32_1 = arith.constant 0 : i32
    return %c0_i32, %c0_i32_0 : i32, i32
  }
  func.func @transform_9(%arg0: i32) -> (i32, i32) {
    %c0_i32 = arith.constant 0 : i32
    %c0_i32_0 = arith.constant 0 : i32
    return %arg0, %c0_i32 : i32, i32
  }
}

</mosaic_0001>

<bundles_post_ra>
// kernel: softh_atom_layer.1
= control target key start
LH: loop header
LB: loop body
LE: loop exit
PB: predicated region body
PF: predicated region fallthrough
CT: control target
= control target key end

     0   :  { %14 = vsyncpa [#allocation4], 0  ;;  %s2637_s0 = inlined_call_operand.vmem [shape: f32[2,8,32], index: 0, kind: input, shape index: {}]   ;;  %s2638_s1 = inlined_call_operand.vmem [shape: f32[2,6,32], index: 1, kind: input, shape index: {}]   ;;  %s2639_s2 = inlined_call_operand.hbm [shape: f32[2,4,32], index: 2, kind: input, shape index: {}]   ;;  %s2640_s3 = inlined_call_operand.hbm [shape: f32[2,2,32], index: 3, kind: input, shape index: {}]   ;;  %s2641_s4 = inlined_call_operand.vmem [shape: f32[10,32], index: 4, kind: input, shape index: {}]   ;;  %s2642_s5 = inlined_call_operand.hbm [shape: f32[10,32], index: 5, kind: input, shape index: {}]   ;;  %s2643_s6 = inlined_call_operand.vmem [shape: f32[10,32], index: 6, kind: input, shape index: {}]   ;;  %s2644_s7 = inlined_call_operand.hbm [shape: f32[10,32], index: 7, kind: input, shape index: {}]   ;;  %s2645_s8 = inlined_call_operand.hbm [shape: f32[10,128], index: 8, kind: input, shape index: {}]   ;;  %s2646_s9 = inlined_call_operand.vmem [shape: f32[2,1], index: 9, kind: output, shape index: {}]  }
   0x1   :  { %15 = vsyncpa [#allocation6], 0 }
   0x2   :  { %16 = vsyncpa [#allocation9], 0  ;;  %s1747_s30 = smov [#allocation5]   ;;  %s1631_s13 = scalar_lea.hbm %s2640_s3, 64 }
   0x3   :  { %s38_s10 = sshll.u32 %s1747_s30, 4  ;;  %p1632_p0 = scmp.ne.s32.totalorder %s2640_s3, %s1631_s13  ;;  %s39_s10 = int_to_ptr.vmem [resolvable:$true] %s38_s10 }
   0x4   :  { %p1635_p1 = scmp.lt.u32.totalorder %s1631_s13, %s2640_s3 }
   0x6   :  { %p1637_p2 = pnand %p1635_p1, %p1632_p0 }
   0x8   :  { %1640 = shalt.err (!%p1637_p2)
}
   0x9   :  { %s1641_s18 = scalar_lea.vmem %s39_s10, 64  ;;  %p1646_p4 = scmp.lt.s32.totalorder %s39_s10, %s39_s10 }
   0xa   :  { %p1642_p3 = scmp.ne.s32.totalorder %s39_s10, %s1641_s18  ;;  %p1647_p5 = scmp.lt.s32.totalorder %s1641_s18, %s1641_s18 }
   0xc   :  { %p1648_p6 = por %p1647_p5, %p1646_p4 }
   0xe   :  { %p1649_p7 = pnand %p1648_p6, %p1642_p3 }
  0x10   :  { %1652 = shalt.err (!%p1649_p7)
}
  0x11   :  { %s1748_s19 = smov 32   ;;  %s1749_s20 = smov 2  }
  0x12   :  { %44 = dma.hbm_to_vmem [thread:$0]  %s2640_s3, 64, %s39_s10, [#allocation6], %s1748_s19, %s1748_s19, %s1749_s20  }
  0x13   :  { %s1750_s23 = smov [#allocation8]   ;;  %s1751_s25 = smov [#allocation3]  }
  0x14   :  { %s66_s24 = sshll.u32 %s1750_s23, 4  ;;  %s26_s26 = sshll.u32 %s1751_s25, 4  ;;  %s67_s24 = int_to_ptr.vmem [resolvable:$true] %s66_s24  ;;  %s27_s26 = int_to_ptr.vmem [resolvable:$true] %s26_s26 }
  0x15   :  { %s1653_s29 = scalar_lea.hbm %s2644_s7, 256 }
  0x16   :  { %p1654_p8 = scmp.ne.s32.totalorder %s2644_s7, %s1653_s29  ;;  %p1657_p9 = scmp.lt.u32.totalorder %s1653_s29, %s2644_s7 }
  0x18   :  { %p1659_p10 = pnand %p1657_p9, %p1654_p8 }
  0x1a   :  { %1662 = shalt.err (!%p1659_p10)
}
  0x1b   :  { %s1663_s3 = scalar_lea.vmem %s67_s24, 256  ;;  %p1668_p12 = scmp.lt.s32.totalorder %s67_s24, %s67_s24 }
  0x1c   :  { %p1664_p11 = scmp.ne.s32.totalorder %s67_s24, %s1663_s3  ;;  %p1669_p13 = scmp.lt.s32.totalorder %s1663_s3, %s1663_s3 }
  0x1e   :  { %p1670_p0 = por %p1669_p13, %p1668_p12 }
  0x20   :  { %p1671_p1 = pnand %p1670_p0, %p1664_p11 }
  0x22   :  { %1674 = shalt.err (!%p1671_p1)
}
  0x23   :  { %s1752_s10 = smov 128   ;;  %s1753_s14 = smov 8  }
  0x24   :  { %72 = dma.hbm_to_vmem [thread:$0]  %s2644_s7, 256, %s67_s24, [#allocation9], %s1752_s10, %s1752_s10, %s1753_s14  }
  0x25   :  { %s1675_s20 = scalar_lea.hbm %s2639_s2, 128 }
  0x26   :  { %p1676_p2 = scmp.ne.s32.totalorder %s2639_s2, %s1675_s20  ;;  %p1679_p3 = scmp.lt.u32.totalorder %s1675_s20, %s2639_s2 }
  0x28   :  { %p1681_p4 = pnand %p1679_p3, %p1676_p2 }
  0x2a   :  { %1684 = shalt.err (!%p1681_p4)
}
  0x2b   :  { %s1685_s27 = scalar_lea.vmem %s27_s26, 128  ;;  %p1690_p6 = scmp.lt.s32.totalorder %s27_s26, %s27_s26 }
  0x2c   :  { %p1686_p5 = scmp.ne.s32.totalorder %s27_s26, %s1685_s27  ;;  %p1691_p7 = scmp.lt.s32.totalorder %s1685_s27, %s1685_s27 }
  0x2e   :  { %p1692_p8 = por %p1691_p7, %p1690_p6 }
  0x30   :  { %p1693_p9 = pnand %p1692_p8, %p1686_p5 }
  0x32   :  { %1696 = shalt.err (!%p1693_p9)
}
  0x33   :  { %s1754_s7 = smov 64   ;;  %s1755_s24 = smov 4  }
  0x34   :  { %32 = dma.hbm_to_vmem [thread:$0]  %s2639_s2, 128, %s27_s26, [#allocation4], %s1754_s7, %s1754_s7, %s1755_s24  }
  0x35   :  { %s1756_s30 = smov [#allocation7]   ;;  %s1757_s12 = smov [#allocation10]  }
  0x36   :  { %s52_s11 = sshll.u32 %s1756_s30, 4  ;;  %s78_s13 = sshll.u32 %s1757_s12, 4  ;;  %s53_s11 = int_to_ptr.vmem [resolvable:$true] %s52_s11  ;;  %s79_s13 = int_to_ptr.vmem [resolvable:$true] %s78_s13 }
  0x37   :  { %s1697_s16 = scalar_lea.hbm %s2642_s5, 256 }
  0x38   :  { %p1698_p10 = scmp.ne.s32.totalorder %s2642_s5, %s1697_s16  ;;  %p1701_p11 = scmp.lt.u32.totalorder %s1697_s16, %s2642_s5 }
  0x3a   :  { %p1703_p12 = pnand %p1701_p11, %p1698_p10 }
  0x3c   :  { %1706 = shalt.err (!%p1703_p12)
}
  0x3d   :  { %s1707_s2 = scalar_lea.vmem %s53_s11, 256  ;;  %p1712_p0 = scmp.lt.s32.totalorder %s53_s11, %s53_s11 }
  0x3e   :  { %p1708_p13 = scmp.ne.s32.totalorder %s53_s11, %s1707_s2  ;;  %p1713_p1 = scmp.lt.s32.totalorder %s1707_s2, %s1707_s2 }
  0x40   :  { %p1714_p2 = por %p1713_p1, %p1712_p0 }
  0x42   :  { %p1715_p3 = pnand %p1714_p2, %p1708_p13 }
  0x44   :  { %1718 = shalt.err (!%p1715_p3)
}
  0x45   :  { %58 = dma.hbm_to_vmem [thread:$0]  %s2642_s5, 256, %s53_s11, [#allocation6], %s1752_s10, %s1752_s10, %s1753_s14  }
  0x46   :  { %s1719_s27 = scalar_lea.hbm %s2645_s8, 256 }
  0x47   :  { %p1720_p4 = scmp.ne.s32.totalorder %s2645_s8, %s1719_s27  ;;  %p1723_p5 = scmp.lt.u32.totalorder %s1719_s27, %s2645_s8 }
  0x49   :  { %p1725_p6 = pnand %p1723_p5, %p1720_p4 }
  0x4b   :  { %1728 = shalt.err (!%p1725_p6)
}
  0x4c   :  { %s1729_s12 = scalar_lea.vmem %s79_s13, 256  ;;  %p1734_p8 = scmp.lt.s32.totalorder %s79_s13, %s79_s13 }
  0x4d   :  { %p1730_p7 = scmp.ne.s32.totalorder %s79_s13, %s1729_s12  ;;  %p1735_p9 = scmp.lt.s32.totalorder %s1729_s12, %s1729_s12 }
  0x4f   :  { %p1736_p10 = por %p1735_p9, %p1734_p8 }
  0x51   :  { %p1737_p11 = pnand %p1736_p10, %p1730_p7 }
  0x53   :  { %1740 = shalt.err (!%p1737_p11)
}
  0x54   :  { %84 = dma.hbm_to_vmem [thread:$0]  %s2645_s8, 256, %s79_s13, [#allocation9], %s1752_s10, %s1752_s10, %s1753_s14  }
  0x55   :  { %1741 = dma.done.wait [#allocation4], 128  }
  0x56   :  { %1742 = vsyncadd [#allocation4], 4294967168 }
  0x57   :  { %1743 = dma.done.wait [#allocation6], 320  }
  0x58   :  { %1744 = vsyncadd [#allocation6], 4294966976 }
  0x59   :  { %1745 = dma.done.wait [#allocation9], 512  }
  0x5a   :  { %1746 = vsyncadd [#allocation9], 4294966784  ;;  %v190_v0 = vlaneseq  ;;  %v368_v2 = vld [vmem:[%s2638_s1] sm:$0x3f]  ;;  %v369_v3 = vld [vmem:[%s2638_s1 + $0x8] sm:$0x3f] }
  0x5b   :  { %v1351_v4 = vadd.f32 1.0, %v368_v2  ;;  %v1352_v5 = vadd.f32 1.0, %v369_v3  ;;  %v1353_v6 = vadd.f32 0.7777778, %v368_v2  ;;  %v1354_v7 = vadd.f32 0.7777778, %v369_v3 }
  0x5c   :  { %v191_v1 = vshrl.u32 %v190_v0, 7  ;;  %v1355_v8 = vadd.f32 0.5555556, %v368_v2  ;;  %v1356_v9 = vadd.f32 0.5555556, %v369_v3  ;;  %v1904_v22 = vld [vmem:[#allocation7] sm:$0xff] }
  0x5d   :  { %v374_v12 = vmul.f32 %v1351_v4, %v1351_v4  ;;  %v375_v13 = vmul.f32 %v1352_v5, %v1352_v5  ;;  %v1357_v16 = vadd.f32 0.33333334, %v368_v2  ;;  %v1358_v17 = vadd.f32 0.33333334, %v369_v3  ;;  %s1758_s20 = smov 96  }
  0x5e   :  { %v1888_v10 = vsub.s32 0, %v191_v1  ;;  %v1890_v11 = vsub.s32 1, %v191_v1  ;;  %v1892_v14 = vsub.s32 2, %v191_v1  ;;  %v1894_v15 = vsub.s32 3, %v191_v1 }
  0x5f   :  { %v1896_v18 = vsub.s32 4, %v191_v1  ;;  %v1898_v19 = vsub.s32 5, %v191_v1  ;;  %v1900_v20 = vsub.s32 6, %v191_v1  ;;  %v1902_v21 = vsub.s32 7, %v191_v1 }
  0x60   :  { %v380_v23 = vmul.f32 %v1353_v6, %v1353_v6  ;;  %v381_v24 = vmul.f32 %v1354_v7, %v1354_v7  ;;  %v386_v25 = vmul.f32 %v1355_v8, %v1355_v8  ;;  %v387_v26 = vmul.f32 %v1356_v9, %v1356_v9  ;;  %v1948_v9 = vld [vmem:[#allocation3 + $0x4] sm:$0xf] }
  0x61   :  { %2649 = vst [vmem:[#allocation14_spill] sm:$0xff] %v1902_v21  ;;  %v1906_v27 = vmul.f32 -2.0, %v374_v12  ;;  %v1908_v28 = vmul.f32 -2.0, %v375_v13  ;;  %v1359_v29 = vadd.f32 0.11111111, %v368_v2  ;;  %v392_v31 = vmul.f32 %v1357_v16, %v1357_v16 }
  0x62   :  { %v1360_v30 = vadd.f32 0.11111111, %v369_v3  ;;  %v393_v32 = vmul.f32 %v1358_v17, %v1358_v17  ;;  %v1361_v33 = vadd.f32 -0.11111111, %v368_v2  ;;  %v1362_v34 = vadd.f32 -0.11111111, %v369_v3 }
  0x63   :  { %v1363_v35 = vadd.f32 -0.33333334, %v368_v2  ;;  %v1364_v36 = vadd.f32 -0.33333334, %v369_v3  ;;  %v1365_v37 = vadd.f32 -0.5555556, %v368_v2  ;;  %v1912_v38 = vrot.slane %v1904_v22, %v1888_v10 }
  0x64   :  { %v1914_v39 = vmul.f32 -2.0, %v380_v23  ;;  %v1916_v40 = vmul.f32 -2.0, %v381_v24  ;;  %v1918_v41 = vmul.f32 -2.0, %v386_v25  ;;  %v1366_v42 = vadd.f32 -0.5555556, %v369_v3 }
  0x65   :  { %v1920_v43 = vmul.f32 -2.0, %v387_v26  ;;  %v398_v44 = vmul.f32 %v1359_v29, %v1359_v29  ;;  %v399_v45 = vmul.f32 %v1360_v30, %v1360_v30  ;;  %v1369_v46 = vadd.f32 -1.0, %v368_v2 }
  0x66   :  { %v1922_v47 = vmul.f32 -2.0, %v392_v31  ;;  %v1924_v48 = vmul.f32 -2.0, %v393_v32  ;;  %v404_v49 = vmul.f32 %v1361_v33, %v1361_v33  ;;  %v1370_v50 = vadd.f32 -1.0, %v369_v3 }
  0x67   :  { %v405_v51 = vmul.f32 %v1362_v34, %v1362_v34  ;;  %v410_v52 = vmul.f32 %v1363_v35, %v1363_v35  ;;  %v411_v53 = vmul.f32 %v1364_v36, %v1364_v36  ;;  %v416_v54 = vmul.f32 %v1365_v37, %v1365_v37 }
  0x68   :  { %v417_v55 = vmul.f32 %v1366_v42, %v1366_v42  ;;  %v1367_v56 = vadd.f32 -0.7777778, %v368_v2  ;;  %v432_v57 = vmax.f32 %v1906_v27, %v1914_v39  ;;  %v433_v58 = vmax.f32 %v1908_v28, %v1916_v40  ;;  %v1938_v2 = vld [vmem:[#allocation3] sm:$0xf] }
  0x69   :  { %v1930_v59 = vmul.f32 -2.0, %v398_v44  ;;  %v1932_v60 = vmul.f32 -2.0, %v399_v45  ;;  %v1368_v61 = vadd.f32 -0.7777778, %v369_v3  ;;  %v428_v62 = vmul.f32 %v1369_v46, %v1369_v46 }
  0x6a   :  { %v1934_v63 = vmul.f32 -2.0, %v404_v49  ;;  %v429_v0 = vmul.f32 %v1370_v50, %v1370_v50  ;;  %v434_v1 = vmax.f32 %v432_v57, %v1918_v41  ;;  %v435_v4 = vmax.f32 %v433_v58, %v1920_v43 }
  0x6b   :  { %v1940_v5 = vmul.f32 -2.0, %v405_v51  ;;  %v1942_v6 = vmul.f32 -2.0, %v410_v52  ;;  %v1944_v7 = vmul.f32 -2.0, %v411_v53  ;;  %v1946_v8 = vmul.f32 -2.0, %v416_v54 }
  0x6c   :  { %v1950_v3 = vmul.f32 -2.0, %v417_v55  ;;  %v422_v12 = vmul.f32 %v1367_v56, %v1367_v56  ;;  %v436_v13 = vmax.f32 %v434_v1, %v1922_v47  ;;  %v437_v16 = vmax.f32 %v435_v4, %v1924_v48  ;;  %v371_v55 = vld [vmem:[#allocation7 + $0x8] sm:$0x3] }
  0x6d   :  { %v423_v17 = vmul.f32 %v1368_v61, %v1368_v61  ;;  %v1954_v23 = vmul.f32 -2.0, %v428_v62  ;;  %v1371_v24 = vadd.f32 1.0, %v1938_v2  ;;  %v1373_v25 = vadd.f32 0.7777778, %v1938_v2 }
  0x6e   :  { %v1958_v26 = vmul.f32 -2.0, %v429_v0  ;;  %v438_v29 = vmax.f32 %v436_v13, %v1930_v59  ;;  %v439_v30 = vmax.f32 %v437_v16, %v1932_v60  ;;  %v1372_v31 = vadd.f32 1.0, %v1948_v9 }
  0x6f   :  { %v1965_v32 = vrot.slane %v1904_v22, %v1890_v11  ;;  %v1374_v33 = vadd.f32 0.7777778, %v1948_v9  ;;  %v1375_v34 = vadd.f32 0.5555556, %v1938_v2  ;;  %v1376_v35 = vadd.f32 0.5555556, %v1948_v9 }
  0x70   :  { %v440_v36 = vmax.f32 %v438_v29, %v1934_v63  ;;  %v441_v37 = vmax.f32 %v439_v30, %v1940_v5  ;;  %v643_v42 = vmul.f32 %v1371_v24, %v1371_v24  ;;  %v649_v44 = vmul.f32 %v1373_v25, %v1373_v25 }
  0x71   :  { %v1972_v45 = vmul.f32 -2.0, %v422_v12  ;;  %v1974_v46 = vmul.f32 -2.0, %v423_v17  ;;  %v1978_v49 = vrot.slane %v1904_v22, %v1892_v14  ;;  %v1982_v50 = vrot.slane %v1904_v22, %v1894_v15 }
  0x72   :  { %v442_v51 = vmax.f32 %v440_v36, %v1942_v6  ;;  %v443_v52 = vmax.f32 %v441_v37, %v1944_v7  ;;  %v1988_v53 = vrot.slane %v1904_v22, %v1896_v18  ;;  %v1992_v54 = vrot.slane %v1904_v22, %v1898_v19 }
  0x73   :  { %v644_v56 = vmul.f32 %v1372_v31, %v1372_v31  ;;  %v650_v57 = vmul.f32 %v1374_v33, %v1374_v33  ;;  %v655_v58 = vmul.f32 %v1375_v34, %v1375_v34  ;;  %v656_v61 = vmul.f32 %v1376_v35, %v1376_v35 }
  0x74   :  { %v444_v62 = vmax.f32 %v442_v51, %v1946_v8  ;;  %v445_v0 = vmax.f32 %v443_v52, %v1950_v3  ;;  %v1996_v1 = vmul.f32 -2.0, %v643_v42  ;;  %v1998_v4 = vmul.f32 -2.0, %v649_v44 }
  0x75   :  { %v2002_v12 = vrot.slane %v1904_v22, %v1900_v20  ;;  %v2006_v13 = vrot.slane %v1904_v22, %v1902_v21  ;;  %v1377_v16 = vadd.f32 0.33333334, %v1938_v2  ;;  %v1378_v17 = vadd.f32 0.33333334, %v1948_v9 }
  0x76   :  { %v446_v24 = vmax.f32 %v444_v62, %v1972_v45  ;;  %v447_v25 = vmax.f32 %v445_v0, %v1974_v46  ;;  %v2013_v29 = vrot.slane %v371_v55, %v1888_v10  ;;  %v2016_v30 = vrot.slane %v371_v55, %v1890_v11 }
  0x77   :  { %v2018_v31 = vmul.f32 -2.0, %v644_v56  ;;  %v2020_v33 = vmul.f32 -2.0, %v650_v57  ;;  %v2022_v22 = vmul.f32 -2.0, %v655_v58  ;;  %v1379_v34 = vadd.f32 0.11111111, %v1938_v2 }
  0x78   :  { %v2026_v35 = vmax.f32 %v446_v24, %v1954_v23  ;;  %v2029_v36 = vmax.f32 %v447_v25, %v1958_v26  ;;  %v2031_v37 = vmul.f32 -2.0, %v656_v61  ;;  %v661_v44 = vmul.f32 %v1377_v16, %v1377_v16 }
  0x79   :  { %v662_v51 = vmul.f32 %v1378_v17, %v1378_v17  ;;  %v1380_v52 = vadd.f32 0.11111111, %v1948_v9  ;;  %v1381_v55 = vadd.f32 -0.11111111, %v1938_v2  ;;  %v667_v16 = vmul.f32 %v1379_v34, %v1379_v34 }
  0x7a   :  { %v450_v56 = vsub.f32 %v1906_v27, %v2026_v35  ;;  %v451_v57 = vsub.f32 %v1908_v28, %v2029_v36  ;;  %v466_v58 = vsub.f32 %v1914_v39, %v2026_v35  ;;  %v467_v61 = vsub.f32 %v1916_v40, %v2029_v36 }
  0x7b   :  { %v482_v62 = vsub.f32 %v1918_v41, %v2026_v35  ;;  %v483_v0 = vsub.f32 %v1920_v43, %v2029_v36  ;;  %v1382_v17 = vadd.f32 -0.11111111, %v1948_v9  ;;  %v498_v28 = vsub.f32 %v1922_v47, %v2026_v35 }
  0x7c   :  { %v452_v24 = vmul.f32 1.442695, %v450_v56  ;;  %v454_v27 = vmul.f32 1.442695, %v451_v57  ;;  %v468_v25 = vmul.f32 1.442695, %v466_v58  ;;  %v499_v39 = vsub.f32 %v1924_v48, %v2029_v36 }
  0x7d   :  { %v470_v42 = vmul.f32 1.442695, %v467_v61  ;;  %v668_v40 = vmul.f32 %v1380_v52, %v1380_v52  ;;  %v673_v21 = vmul.f32 %v1381_v55, %v1381_v55  ;;  %v484_v41 = vmul.f32 1.442695, %v482_v62 }
  0x7e   :  { %1433 = vpow2.f32 %v452_v24  ;;  %v514_v43 = vsub.f32 %v1930_v59, %v2026_v35  ;;  %v2056_v34 = vmul.f32 -2.0, %v661_v44  ;;  %v486_v56 = vmul.f32 1.442695, %v483_v0 }
  0x7f   :  { %1435 = vpow2.f32 %v454_v27  ;;  %v515_v57 = vsub.f32 %v1932_v60, %v2029_v36  ;;  %v2060_v58 = vmul.f32 -2.0, %v662_v51  ;;  %v500_v47 = vmul.f32 1.442695, %v498_v28 }
  0x80   :  { %1437 = vpow2.f32 %v468_v25  ;;  %v530_v48 = vsub.f32 %v1934_v63, %v2026_v35  ;;  %v2064_v52 = vmul.f32 -2.0, %v667_v16  ;;  %v502_v55 = vmul.f32 1.442695, %v499_v39 }
  0x81   :  { %1439 = vpow2.f32 %v470_v42  ;;  %v531_v59 = vsub.f32 %v1940_v5, %v2029_v36  ;;  %v674_v44 = vmul.f32 %v1382_v17, %v1382_v17  ;;  %v516_v61 = vmul.f32 1.442695, %v514_v43 }
  0x82   :  { %1441 = vpow2.f32 %v484_v41  ;;  %v546_v60 = vsub.f32 %v1942_v6, %v2026_v35  ;;  %v2070_v51 = vmul.f32 -2.0, %v668_v40  ;;  %v518_v62 = vmul.f32 1.442695, %v515_v57 }
  0x83   :  { %1443 = vpow2.f32 %v486_v56  ;;  %v547_v63 = vsub.f32 %v1944_v7, %v2029_v36  ;;  %v2074_v0 = vmul.f32 -2.0, %v673_v21  ;;  %v532_v42 = vmul.f32 1.442695, %v530_v48 }
  0x84   :  { %1445 = vpow2.f32 %v500_v47  ;;  %v562_v5 = vsub.f32 %v1946_v8, %v2026_v35  ;;  %v563_v16 = vsub.f32 %v1950_v3, %v2029_v36  ;;  %v534_v17 = vmul.f32 1.442695, %v531_v59 }
  0x85   :  { %1447 = vpow2.f32 %v502_v55  ;;  %v578_v6 = vsub.f32 %v1972_v45, %v2026_v35  ;;  %v1383_v24 = vadd.f32 -0.33333334, %v1938_v2  ;;  %v548_v27 = vmul.f32 1.442695, %v546_v60 }
  0x86   :  { %1449 = vpow2.f32 %v516_v61  ;;  %v579_v21 = vsub.f32 %v1974_v46, %v2029_v36  ;;  %v1384_v7 = vadd.f32 -0.33333334, %v1948_v9  ;;  %v550_v25 = vmul.f32 1.442695, %v547_v63 }
  0x87   :  { %1451 = vpow2.f32 %v518_v62  ;;  %v594_v8 = vsub.f32 %v1954_v23, %v2026_v35  ;;  %v2088_v3 = vmul.f32 -2.0, %v674_v44  ;;  %v564_v39 = vmul.f32 1.442695, %v562_v5 }
  0x88   :  { %v1434_v28 = vpop.eup %1433  ;;  %1453 = vpow2.f32 %v532_v42  ;;  %v566_v45 = vmul.f32 1.442695, %v563_v16  ;;  %v595_v40 = vsub.f32 %v1958_v26, %v2029_v36  ;;  %v580_v46 = vmul.f32 1.442695, %v578_v6 }
  0x89   :  { %v1436_v41 = vpop.eup %1435  ;;  %v462_v43 = vmul.f32 %v1434_v28, %v1912_v38  ;;  %1455 = vpow2.f32 %v534_v17  ;;  %v679_v56 = vmul.f32 %v1383_v24, %v1383_v24  ;;  %v582_v23 = vmul.f32 1.442695, %v579_v21 }
  0x8a   :  { %v1438_v57 = vpop.eup %1437  ;;  %v463_v47 = vmul.f32 %v1436_v41, %v1912_v38  ;;  %1457 = vpow2.f32 %v548_v27  ;;  %v680_v35 = vmul.f32 %v1384_v7, %v1384_v7  ;;  %v596_v44 = vmul.f32 1.442695, %v594_v8 }
  0x8b   :  { %v1440_v48 = vpop.eup %1439  ;;  %v472_v55 = vadd.f32 %v1438_v57, %v1434_v28  ;;  %v478_v59 = vmul.f32 %v1438_v57, %v1965_v32  ;;  %1459 = vpow2.f32 %v550_v25  ;;  %v598_v60 = vmul.f32 1.442695, %v595_v40 }
  0x8c   :  { %v1442_v61 = vpop.eup %1441  ;;  %v473_v26 = vadd.f32 %v1440_v48, %v1436_v41  ;;  %v479_v36 = vmul.f32 %v1440_v48, %v1965_v32  ;;  %1461 = vpow2.f32 %v564_v39  ;;  %vm614_vm0 = vcmask 259072  }
  0x8d   :  { %v1444_v62 = vpop.eup %1443  ;;  %v480_v63 = vadd.f32 %v478_v59, %v462_v43  ;;  %v488_v42 = vadd.f32 %v1442_v61, %v472_v55  ;;  %v494_v38 = vmul.f32 %v1442_v61, %v1978_v49  ;;  %1463 = vpow2.f32 %v566_v45 }
  0x8e   :  { %v1446_v5 = vpop.eup %1445  ;;  %v481_v16 = vadd.f32 %v479_v36, %v463_v47  ;;  %v489_v17 = vadd.f32 %v1444_v62, %v473_v26  ;;  %v495_v6 = vmul.f32 %v1444_v62, %v1978_v49  ;;  %1465 = vpow2.f32 %v580_v46 }
  0x8f   :  { %v1448_v24 = vpop.eup %1447  ;;  %v496_v27 = vadd.f32 %v494_v38, %v480_v63  ;;  %v504_v21 = vadd.f32 %v1446_v5, %v488_v42  ;;  %v510_v7 = vmul.f32 %v1446_v5, %v1982_v50  ;;  %1467 = vpow2.f32 %v582_v23 }
  0x90   :  { %v1450_v32 = vpop.eup %1449  ;;  %v497_v25 = vadd.f32 %v495_v6, %v481_v16  ;;  %v505_v8 = vadd.f32 %v1448_v24, %v489_v17  ;;  %v511_v28 = vmul.f32 %v1448_v24, %v1982_v50  ;;  %1469 = vpow2.f32 %v596_v44 }
  0x91   :  { %v1452_v39 = vpop.eup %1451  ;;  %v512_v45 = vadd.f32 %v510_v7, %v496_v27  ;;  %v520_v40 = vadd.f32 %v1450_v32, %v504_v21  ;;  %v526_v41 = vmul.f32 %v1450_v32, %v1988_v53  ;;  %1471 = vpow2.f32 %v598_v60 }
  0x92   :  { %v1454_v49 = vpop.eup %1453  ;;  %v513_v43 = vadd.f32 %v511_v28, %v497_v25  ;;  %v521_v46 = vadd.f32 %v1452_v39, %v505_v8  ;;  %v527_v57 = vmul.f32 %v1452_v39, %v1988_v53  ;;  %v1389_v47 = vadd.f32 -1.0, %v1938_v2 }
  0x93   :  { %v1456_v23 = vpop.eup %1455  ;;  %v528_v48 = vadd.f32 %v526_v41, %v512_v45  ;;  %v536_v55 = vadd.f32 %v1454_v49, %v520_v40  ;;  %v542_v59 = vmul.f32 %v1454_v49, %v1992_v54  ;;  %v2104_v50 = vmul.f32 -2.0, %v679_v56 }
  0x94   :  { %v1458_v44 = vpop.eup %1457  ;;  %v529_v61 = vadd.f32 %v527_v57, %v513_v43  ;;  %v537_v26 = vadd.f32 %v1456_v23, %v521_v46  ;;  %v543_v36 = vmul.f32 %v1456_v23, %v1992_v54  ;;  %v2107_v60 = vmul.f32 -2.0, %v680_v35 }
  0x95   :  { %v1460_v62 = vpop.eup %1459  ;;  %v544_v63 = vadd.f32 %v542_v59, %v528_v48  ;;  %v552_v42 = vadd.f32 %v1458_v44, %v536_v55  ;;  %v558_v53 = vmul.f32 %v1458_v44, %v2002_v12  ;;  %v1385_v38 = vadd.f32 -0.5555556, %v1938_v2 }
  0x96   :  { %v1462_v5 = vpop.eup %1461  ;;  %v545_v16 = vadd.f32 %v543_v36, %v529_v61  ;;  %v553_v17 = vadd.f32 %v1460_v62, %v537_v26  ;;  %v559_v56 = vmul.f32 %v1460_v62, %v2002_v12  ;;  %v1386_v6 = vadd.f32 -0.5555556, %v1948_v9 }
  0x97   :  { %v1464_v24 = vpop.eup %1463  ;;  %v560_v27 = vadd.f32 %v558_v53, %v544_v63  ;;  %v568_v21 = vadd.f32 %v1462_v5, %v552_v42  ;;  %v574_v54 = vmul.f32 %v1462_v5, %v2006_v13  ;;  %v1387_v35 = vadd.f32 -0.7777778, %v1938_v2 }
  0x98   :  { %v1466_v7 = vpop.eup %1465  ;;  %v561_v32 = vadd.f32 %v559_v56, %v545_v16  ;;  %v569_v25 = vadd.f32 %v1464_v24, %v553_v17  ;;  %v575_v8 = vmul.f32 %v1464_v24, %v2006_v13  ;;  %v702_v28 = vmax.f32 %v2018_v31, %v2020_v33 }
  0x99   :  { %v1468_v39 = vpop.eup %1467  ;;  %v584_v45 = vadd.f32 %v1466_v7, %v568_v21  ;;  %v1388_v12 = vadd.f32 -0.7777778, %v1948_v9  ;;  %v1390_v40 = vadd.f32 -1.0, %v1948_v9  ;;  %v2650_v41 = vmax.f32 %v1996_v1, %v1998_v4 }
  0x9a   :  { %v1470_v2 = vpop.eup %1469  ;;  %v585_v43 = vadd.f32 %v1468_v39, %v569_v25  ;;  %v685_v46 = vmul.f32 %v1385_v38, %v1385_v38  ;;  %v686_v57 = vmul.f32 %v1386_v6, %v1386_v6  ;;  %v704_v13 = vmax.f32 %v702_v28, %v2031_v37 }
  0x9b   :  { %v703_v49 = vmax.f32 %v2650_v41, %v2022_v22  ;;  %v1472_v23 = vpop.eup %1471  ;;  %v576_v48 = vadd.f32 %v574_v54, %v560_v27  ;;  %v590_v55 = vmul.f32 %v1466_v7, %v2013_v29  ;;  %v600_v59 = vadd.f32 %v1470_v2, %v584_v45  ;;  %v639_v54 = vld [vmem:[%s2643_s6] sm:$0xff]  ;;  %v640_v45 = vld [vmem:[%s2643_s6 + $0x8] sm:$0x3] }
  0x9c   :  { %v577_v61 = vadd.f32 %v575_v8, %v561_v32  ;;  %v591_v9 = vmul.f32 %v1468_v39, %v2013_v29  ;;  %v601_v26 = vadd.f32 %v1472_v23, %v585_v43  ;;  %v706_v36 = vmax.f32 %v704_v13, %v2060_v58 }
  0x9d   :  { %v705_v44 = vmax.f32 %v703_v49, %v2056_v34  ;;  %1473 = vrcp.f32 %v600_v59  ;;  %v691_v62 = vmul.f32 %v1387_v35, %v1387_v35  ;;  %v692_v63 = vmul.f32 %v1388_v12, %v1388_v12 }
  0x9e   :  { %1475 = vrcp.f32 %v601_v26  ;;  %v2130_v53 = vmul.f32 -2.0, %v685_v46  ;;  %v2132_v38 = vmul.f32 -2.0, %v686_v57  ;;  %v708_v5 = vmax.f32 %v706_v36, %v2070_v51  ;;  %v2170_v46 = vld [vmem:[#allocation5] sm:$0x3]  ;;  %v2172_v57 = vld [vmem:[#allocation5 + $0x2] sm:$0x3] }
  0x9f   :  { %v707_v42 = vmax.f32 %v705_v44, %v2064_v52  ;;  %v592_v16 = vadd.f32 %v590_v55, %v576_v48  ;;  %v697_v17 = vmul.f32 %v1389_v47, %v1389_v47  ;;  %v698_v56 = vmul.f32 %v1390_v40, %v1390_v40 }
  0xa0   :  { %v593_v6 = vadd.f32 %v591_v9, %v577_v61  ;;  %v606_v24 = vmul.f32 %v1470_v2, %v2016_v30  ;;  %v607_v27 = vmul.f32 %v1472_v23, %v2016_v30  ;;  %v710_v21 = vmax.f32 %v708_v5, %v2088_v3  ;;  %v2651_v61 = vld [vmem:[#allocation14_spill] sm:$0xff] }
  0xa1   :  { %v709_v29 = vmax.f32 %v707_v42, %v2074_v0  ;;  %v2142_v35 = vmul.f32 -2.0, %v691_v62  ;;  %v2145_v32 = vmul.f32 -2.0, %v692_v63  ;;  %v2148_v25 = vmul.f32 -2.0, %v697_v17 }
  0xa2   :  { %v712_v47 = vmax.f32 %v710_v21, %v2107_v60  ;;  %v2150_v8 = vmul.f32 -2.0, %v698_v56  ;;  %v608_v28 = vadd.f32 %v606_v24, %v592_v16  ;;  %v609_v39 = vadd.f32 %v607_v27, %v593_v6 }
  0xa3   :  { %v711_v7 = vmax.f32 %v709_v29, %v2104_v50  ;;  %v2158_v40 = vrot.slane %v639_v54, %v1888_v10  ;;  %v2162_v49 = vrot.slane %v639_v54, %v1890_v11  ;;  %v2165_v2 = vrot.slane %v639_v54, %v1892_v14 }
  0xa4   :  { %v714_v12 = vmax.f32 %v712_v47, %v2132_v38  ;;  %v2168_v43 = vrot.slane %v639_v54, %v1894_v15  ;;  %v2176_v23 = vrot.slane %v639_v54, %v1896_v18  ;;  %v2179_v48 = vrot.slane %v639_v54, %v1898_v19 }
  0xa5   :  { %v713_v30 = vmax.f32 %v711_v7, %v2130_v53  ;;  %v2182_v55 = vrot.slane %v639_v54, %v1900_v20  ;;  %v2188_v9 = vrot.slane %v639_v54, %v2651_v61  ;;  %v2191_v26 = vrot.slane %v640_v45, %v1888_v10 }
  0xa6   :  { %v716_v13 = vmax.f32 %v714_v12, %v2145_v32  ;;  %v2194_v36 = vrot.slane %v640_v45, %v1890_v11  ;;  %v2200_v5 = vadd.f32 1.0, %v2170_v46  ;;  %v2203_v16 = vadd.f32 1.0, %v2172_v57 }
  0xa7   :  { %v715_v41 = vmax.f32 %v713_v30, %v2142_v35  ;;  %v1474_v59 = vpop.eup %1473  ;;  %vm363_vm1 = vcmask 1041409   ;;  %vm883_vm2 = vcmask 257024   ;;  %vm366_vm3 = vcmask 254976  }
  0xa8   :  { %v1476_v62 = vpop.eup %1475  ;;  %v611_v63 = vmul.f32 %v1474_v59, %v608_v28  ;;  %v2197_v42 = vmax.f32 %v716_v13, %v2150_v8  ;;  %vm346_vm4 = vcmask 261120   ;;  %vm635_vm5 = vcmask 517376  }
  0xa9   :  { %v2185_v44 = vmax.f32 %v715_v41, %v2148_v25  ;;  %v613_v17 = vmul.f32 %v1476_v62, %v609_v39  ;;  %vm904_vm6 = vcmask 779776   ;;  %vm1172_vm7 = vcmask 1042176  }
  0xaa   :  { %v615_v24 = vsel %vm614_vm0, %v611_v63, 0.0  ;;  %v720_v27 = vsub.f32 %v2018_v31, %v2197_v42  ;;  %v736_v21 = vsub.f32 %v2020_v33, %v2197_v42  ;;  %v752_v54 = vsub.f32 %v2031_v37, %v2197_v42 }
  0xab   :  { %v719_v56 = vsub.f32 %v1996_v1, %v2185_v44  ;;  %v735_v29 = vsub.f32 %v1998_v4, %v2185_v44  ;;  %v751_v6 = vsub.f32 %v2022_v22, %v2185_v44  ;;  %v616_v7 = vrot.slane %v615_v24, 4 }
  0xac   :  { %v622_v1 = vsel %vm614_vm0, %v613_v17, 0.0  ;;  %v723_v28 = vmul.f32 1.442695, %v720_v27  ;;  %v739_v39 = vmul.f32 1.442695, %v736_v21  ;;  %v767_v22 = vsub.f32 %v2056_v34, %v2185_v44 }
  0xad   :  { %v721_v47 = vmul.f32 1.442695, %v719_v56  ;;  %v737_v30 = vmul.f32 1.442695, %v735_v29  ;;  %v623_v4 = vrot.slane %v622_v1, 4  ;;  %v617_v45 = vadd.f32 %v616_v7, %v615_v24 }
  0xae   :  { %v753_v31 = vmul.f32 1.442695, %v751_v6  ;;  %v755_v12 = vmul.f32 1.442695, %v752_v54  ;;  %v768_v37 = vsub.f32 %v2060_v58, %v2197_v42  ;;  %v769_v41 = vmul.f32 1.442695, %v767_v22 }
  0xaf   :  { %1477 = vpow2.f32 %v721_v47  ;;  %v624_v33 = vadd.f32 %v623_v4, %v622_v1  ;;  %v618_v13 = vrot.slane %v617_v45, 2  ;;  %v783_v59 = vsub.f32 %v2064_v52, %v2185_v44 }
  0xb0   :  { %1479 = vpow2.f32 %v723_v28  ;;  %v784_v62 = vsub.f32 %v2070_v51, %v2197_v42  ;;  %v771_v63 = vmul.f32 1.442695, %v768_v37  ;;  %v799_v17 = vsub.f32 %v2074_v0, %v2185_v44 }
  0xb1   :  { %1481 = vpow2.f32 %v737_v30  ;;  %v625_v34 = vrot.slane %v624_v33, 2  ;;  %v619_v56 = vadd.f32 %v618_v13, %v617_v45  ;;  %v785_v29 = vmul.f32 1.442695, %v783_v59 }
  0xb2   :  { %1483 = vpow2.f32 %v739_v39  ;;  %v787_v6 = vmul.f32 1.442695, %v784_v62  ;;  %v800_v24 = vsub.f32 %v2088_v3, %v2197_v42  ;;  %v801_v27 = vmul.f32 1.442695, %v799_v17 }
  0xb3   :  { %1485 = vpow2.f32 %v753_v31  ;;  %v626_v58 = vadd.f32 %v625_v34, %v624_v33  ;;  %v620_v52 = vrot.slane %v619_v56, 1  ;;  %v815_v51 = vsub.f32 %v2104_v50, %v2185_v44 }
  0xb4   :  { %1487 = vpow2.f32 %v755_v12  ;;  %v816_v21 = vsub.f32 %v2107_v60, %v2197_v42  ;;  %v803_v0 = vmul.f32 1.442695, %v800_v24  ;;  %v831_v7 = vsub.f32 %v2130_v53, %v2185_v44 }
  0xb5   :  { %1489 = vpow2.f32 %v769_v41  ;;  %v627_v54 = vrot.slane %v626_v58, 1  ;;  %v621_v1 = vadd.f32 %v620_v52, %v619_v56  ;;  %v817_v47 = vmul.f32 1.442695, %v815_v51 }
  0xb6   :  { %1491 = vpow2.f32 %v771_v63  ;;  %v819_v30 = vmul.f32 1.442695, %v816_v21  ;;  %v832_v4 = vsub.f32 %v2132_v38, %v2197_v42  ;;  %v833_v28 = vmul.f32 1.442695, %v831_v7 }
  0xb7   :  { %1493 = vpow2.f32 %v785_v29  ;;  %v628_v3 = vadd.f32 %v627_v54, %v626_v58  ;;  %v847_v60 = vsub.f32 %v2142_v35, %v2185_v44  ;;  %v848_v39 = vsub.f32 %v2145_v32, %v2197_v42 }
  0xb8   :  { %1495 = vpow2.f32 %v787_v6  ;;  %v863_v53 = vsub.f32 %v2148_v25, %v2185_v44  ;;  %v835_v12 = vmul.f32 1.442695, %v832_v4  ;;  %v864_v25 = vsub.f32 %v2150_v8, %v2197_v42 }
  0xb9   :  { %v1478_v50 = vpop.eup %1477  ;;  %1497 = vpow2.f32 %v801_v27  ;;  %v631_v45 = vsel %vm363_vm1, %v628_v3, %v621_v1  ;;  %v849_v35 = vmul.f32 1.442695, %v847_v60  ;;  %v851_v37 = vmul.f32 1.442695, %v848_v39 }
  0xba   :  { %v1480_v22 = vpop.eup %1479  ;;  %v731_v31 = vmul.f32 %v1478_v50, %v2158_v40  ;;  %1499 = vpow2.f32 %v803_v0  ;;  %632 = vrot.lane.b32.xlu0 %v631_v45, %s1748_s19  ;;  %v865_v34 = vmul.f32 1.442695, %v863_v53  ;;  %vm1318_vm8 = vcmask 1041408  }
  0xbb   :  { %v1482_v38 = vpop.eup %1481  ;;  %v732_v33 = vmul.f32 %v1480_v22, %v2158_v40  ;;  %1501 = vpow2.f32 %v817_v47  ;;  %vm1322_vm9 = vcmask 1024  }
  0xbc   :  { %v1484_v41 = vpop.eup %1483  ;;  %v741_v32 = vadd.f32 %v1482_v38, %v1478_v50  ;;  %v747_v13 = vmul.f32 %v1482_v38, %v2162_v49  ;;  %1503 = vpow2.f32 %v819_v30  ;;  %v867_v30 = vmul.f32 1.442695, %v864_v25 }
  0xbd   :  { %v1486_v44 = vpop.eup %1485  ;;  %v742_v59 = vadd.f32 %v1484_v41, %v1480_v22  ;;  %v748_v62 = vmul.f32 %v1484_v41, %v2162_v49  ;;  %1505 = vpow2.f32 %v833_v28  ;;  %v1393_v50 = vadd.f32 0.7777778, %v2170_v46 }
  0xbe   :  { %v1488_v63 = vpop.eup %1487  ;;  %v749_v17 = vadd.f32 %v747_v13, %v731_v31  ;;  %v757_v40 = vadd.f32 %v1486_v44, %v741_v32  ;;  %v763_v56 = vmul.f32 %v1486_v44, %v2165_v2  ;;  %1507 = vpow2.f32 %v835_v12 }
  0xbf   :  { %v1490_v29 = vpop.eup %1489  ;;  %v750_v6 = vadd.f32 %v748_v62, %v732_v33  ;;  %v758_v58 = vadd.f32 %v1488_v63, %v742_v59  ;;  %v764_v24 = vmul.f32 %v1488_v63, %v2165_v2  ;;  %1509 = vpow2.f32 %v849_v35 }
  0xc0   :  { %v1492_v27 = vpop.eup %1491  ;;  %v765_v8 = vadd.f32 %v763_v56, %v749_v17  ;;  %v773_v42 = vadd.f32 %v1490_v29, %v757_v40  ;;  %v779_v52 = vmul.f32 %v1490_v29, %v2168_v43  ;;  %1511 = vpow2.f32 %v851_v37 }
  0xc1   :  { %v1494_v49 = vpop.eup %1493  ;;  %v766_v51 = vadd.f32 %v764_v24, %v750_v6  ;;  %v774_v21 = vadd.f32 %v1492_v27, %v758_v58  ;;  %v780_v54 = vmul.f32 %v1492_v27, %v2168_v43  ;;  %1513 = vpow2.f32 %v865_v34 }
  0xc2   :  { %v1496_v0 = vpop.eup %1495  ;;  %v781_v7 = vadd.f32 %v779_v52, %v765_v8  ;;  %v789_v1 = vadd.f32 %v1494_v49, %v773_v42  ;;  %v795_v47 = vmul.f32 %v1494_v49, %v2176_v23  ;;  %1515 = vpow2.f32 %v867_v30 }
  0xc3   :  { %v1498_v2 = vpop.eup %1497  ;;  %v782_v3 = vadd.f32 %v780_v54, %v766_v51  ;;  %v790_v4 = vadd.f32 %v1496_v0, %v774_v21  ;;  %v796_v28 = vmul.f32 %v1496_v0, %v2176_v23  ;;  %v1394_v38 = vadd.f32 0.7777778, %v2172_v57 }
  0xc4   :  { %v1500_v60 = vpop.eup %1499  ;;  %v797_v39 = vadd.f32 %v795_v47, %v781_v7  ;;  %v805_v53 = vadd.f32 %v1498_v2, %v789_v1  ;;  %v811_v22 = vmul.f32 %v1498_v2, %v2179_v48  ;;  %v1395_v41 = vadd.f32 0.5555556, %v2170_v46 }
  0xc5   :  { %v1502_v43 = vpop.eup %1501  ;;  %v798_v45 = vadd.f32 %v796_v28, %v782_v3  ;;  %v806_v31 = vadd.f32 %v1500_v60, %v790_v4  ;;  %v812_v12 = vmul.f32 %v1500_v60, %v2179_v48  ;;  %v912_v59 = vmul.f32 %v2200_v5, %v2200_v5 }
  0xc6   :  { %v1504_v33 = vpop.eup %1503  ;;  %v813_v35 = vadd.f32 %v811_v22, %v797_v39  ;;  %v821_v37 = vadd.f32 %v1502_v43, %v805_v53  ;;  %v827_v23 = vmul.f32 %v1502_v43, %v2182_v55  ;;  %v913_v17 = vmul.f32 %v2203_v16, %v2203_v16 }
  0xc7   :  { %v1506_v32 = vpop.eup %1505  ;;  %v814_v13 = vadd.f32 %v812_v12, %v798_v45  ;;  %v822_v25 = vadd.f32 %v1504_v33, %v806_v31  ;;  %v828_v44 = vmul.f32 %v1504_v33, %v2182_v55  ;;  %v918_v29 = vmul.f32 %v1393_v50, %v1393_v50 }
  0xc8   :  { %v1508_v62 = vpop.eup %1507  ;;  %v829_v34 = vadd.f32 %v827_v23, %v813_v35  ;;  %v837_v48 = vadd.f32 %v1506_v32, %v821_v37  ;;  %v843_v63 = vmul.f32 %v1506_v32, %v2188_v9  ;;  %v919_v6 = vmul.f32 %v1394_v38, %v1394_v38 }
  0xc9   :  { %v1510_v40 = vpop.eup %1509  ;;  %v838_v56 = vadd.f32 %v1508_v62, %v822_v25  ;;  %v1396_v58 = vadd.f32 0.5555556, %v2172_v57  ;;  %v924_v55 = vmul.f32 %v1395_v41, %v1395_v41  ;;  %v1397_v8 = vadd.f32 0.33333334, %v2170_v46 }
  0xca   :  { %v1512_v24 = vpop.eup %1511  ;;  %v853_v27 = vadd.f32 %v1510_v40, %v837_v48  ;;  %v1398_v5 = vadd.f32 0.33333334, %v2172_v57  ;;  %v830_v52 = vadd.f32 %v828_v44, %v814_v13  ;;  %v844_v49 = vmul.f32 %v1508_v62, %v2188_v9 }
  0xcb   :  { %v1514_v42 = vpop.eup %1513  ;;  %v854_v51 = vadd.f32 %v1512_v24, %v838_v56  ;;  %v1399_v16 = vadd.f32 0.11111111, %v2170_v46  ;;  %v845_v21 = vadd.f32 %v843_v63, %v829_v34  ;;  %v859_v54 = vmul.f32 %v1510_v40, %v2191_v26 }
  0xcc   :  { %v869_v0 = vadd.f32 %v1514_v42, %v853_v27  ;;  %v2277_v7 = vmul.f32 -2.0, %v912_v59  ;;  %v2279_v1 = vmul.f32 -2.0, %v913_v17  ;;  %v2281_v47 = vmul.f32 -2.0, %v918_v29  ;;  %v1516_v3 = vpop.eup %1515 }
  0xcd   :  { %v925_v30 = vmul.f32 %v1396_v58, %v1396_v58  ;;  %v1400_v2 = vadd.f32 0.11111111, %v2172_v57  ;;  %v2284_v4 = vmul.f32 -2.0, %v919_v6  ;;  %v930_v9 = vmul.f32 %v1397_v8, %v1397_v8 }
  0xce   :  { %1517 = vrcp.f32 %v869_v0  ;;  %v931_v28 = vmul.f32 %v1398_v5, %v1398_v5  ;;  %v846_v50 = vadd.f32 %v844_v49, %v830_v52  ;;  %v860_v60 = vmul.f32 %v1512_v24, %v2191_v26  ;;  %v908_v0 = vld [vmem:[#allocation8] sm:$0xff] }
  0xcf   :  { %v870_v39 = vadd.f32 %v1516_v3, %v854_v51  ;;  %v936_v53 = vmul.f32 %v1399_v16, %v1399_v16  ;;  %v861_v22 = vadd.f32 %v859_v54, %v845_v21  ;;  %v875_v43 = vmul.f32 %v1514_v42, %v2194_v36 }
  0xd0   :  { %v1401_v45 = vadd.f32 -0.11111111, %v2170_v46  ;;  %v1402_v31 = vadd.f32 -0.11111111, %v2172_v57  ;;  %v2290_v12 = vmul.f32 -2.0, %v924_v55  ;;  %v937_v38 = vmul.f32 %v1400_v2, %v1400_v2 }
  0xd1   :  { %1519 = vrcp.f32 %v870_v39  ;;  %v1403_v33 = vadd.f32 -0.33333334, %v2170_v46  ;;  %v2293_v35 = vmul.f32 -2.0, %v925_v30  ;;  %v2295_v37 = vmul.f32 -2.0, %v930_v9 }
  0xd2   :  { %v1404_v26 = vadd.f32 -0.33333334, %v2172_v57  ;;  %v1405_v23 = vadd.f32 -0.5555556, %v2170_v46  ;;  %v862_v41 = vadd.f32 %v860_v60, %v846_v50  ;;  %v876_v32 = vmul.f32 %v1516_v3, %v2194_v36 }
  0xd3   :  { %v2300_v13 = vmul.f32 -2.0, %v931_v28  ;;  %v2302_v25 = vmul.f32 -2.0, %v936_v53  ;;  %v877_v44 = vadd.f32 %v875_v43, %v861_v22  ;;  %v942_v59 = vmul.f32 %v1401_v45, %v1401_v45 }
  0xd4   :  { %v943_v62 = vmul.f32 %v1402_v31, %v1402_v31  ;;  %v970_v34 = vmax.f32 %v2277_v7, %v2281_v47  ;;  %v2306_v48 = vmul.f32 -2.0, %v937_v38  ;;  %v948_v63 = vmul.f32 %v1403_v33, %v1403_v33 }
  0xd5   :  { %v1406_v17 = vadd.f32 -0.5555556, %v2172_v57  ;;  %v1407_v40 = vadd.f32 -0.7777778, %v2170_v46  ;;  %v949_v56 = vmul.f32 %v1404_v26, %v1404_v26  ;;  %v954_v29 = vmul.f32 %v1405_v23, %v1405_v23 }
  0xd6   :  { %v971_v36 = vmax.f32 %v2279_v1, %v2284_v4  ;;  %v972_v6 = vmax.f32 %v970_v34, %v2290_v12  ;;  %v878_v58 = vadd.f32 %v876_v32, %v862_v41  ;;  %v1408_v24 = vadd.f32 -0.7777778, %v2172_v57 }
  0xd7   :  { %v1409_v27 = vadd.f32 -1.0, %v2170_v46  ;;  %v1410_v55 = vadd.f32 -1.0, %v2172_v57  ;;  %v2316_v5 = vmul.f32 -2.0, %v942_v59  ;;  %v2318_v42 = vmul.f32 -2.0, %v943_v62  ;;  %v2354_v59 = vld [vmem:[%s2637_s0 + $0x8] sm:$0xff] }
  0xd8   :  { %v1518_v8 = vpop.eup %1517  ;;  %v973_v52 = vmax.f32 %v971_v36, %v2293_v35  ;;  %v974_v49 = vmax.f32 %v972_v6, %v2295_v37  ;;  %v2322_v16 = vmul.f32 -2.0, %v948_v63  ;;  %v955_v21 = vmul.f32 %v1406_v17, %v1406_v17 }
  0xd9   :  { %v880_v51 = vmul.f32 %v1518_v8, %v877_v44  ;;  %v960_v54 = vmul.f32 %v1407_v40, %v1407_v40  ;;  %v2324_v30 = vmul.f32 -2.0, %v949_v56  ;;  %v2326_v46 = vmul.f32 -2.0, %v954_v29  ;;  %v2349_v44 = vld [vmem:[%s2637_s0] sm:$0xff] }
  0xda   :  { %v975_v57 = vmax.f32 %v973_v52, %v2300_v13  ;;  %v976_v2 = vmax.f32 %v974_v49, %v2302_v25  ;;  %v961_v28 = vmul.f32 %v1408_v24, %v1408_v24  ;;  %v966_v50 = vmul.f32 %v1409_v27, %v1409_v27 }
  0xdb   :  { %v1520_v3 = vpop.eup %1519  ;;  %v884_v9 = vsel %vm883_vm2, %v880_v51, 0.0  ;;  %v967_v60 = vmul.f32 %v1410_v55, %v1410_v55  ;;  %v2333_v45 = vmul.f32 -2.0, %v955_v21  ;;  %v2335_v31 = vmul.f32 -2.0, %v960_v54 }
  0xdc   :  { %v882_v39 = vmul.f32 %v1520_v3, %v878_v58  ;;  %v885_v53 = vrot.slane %v884_v9, 4  ;;  %v977_v22 = vmax.f32 %v975_v57, %v2306_v48  ;;  %v978_v43 = vmax.f32 %v976_v2, %v2316_v5  ;;  %v909_v58 = vld [vmem:[#allocation8 + $0x8] sm:$0x3] }
  0xdd   :  { %v2338_v38 = vrot.slane %v908_v0, %v1888_v10  ;;  %v2341_v33 = vrot.slane %v908_v0, %v1890_v11  ;;  %v2356_v34 = vmul.f32 -2.0, %v961_v28  ;;  %v2358_v63 = vmul.f32 -2.0, %v966_v50 }
  0xde   :  { %v886_v26 = vadd.f32 %v885_v53, %v884_v9  ;;  %v891_v23 = vsel %vm883_vm2, %v882_v39, 0.0  ;;  %v979_v41 = vmax.f32 %v977_v22, %v2318_v42  ;;  %v980_v32 = vmax.f32 %v978_v43, %v2322_v16 }
  0xdf   :  { %v892_v62 = vrot.slane %v891_v23, 4  ;;  %v2360_v17 = vmul.f32 -2.0, %v967_v60  ;;  %v2365_v36 = vrot.slane %v908_v0, %v1892_v14  ;;  %v2368_v24 = vrot.slane %v908_v0, %v1894_v15 }
  0xe0   :  { %v887_v40 = vrot.slane %v886_v26, 2  ;;  %v981_v56 = vmax.f32 %v979_v41, %v2324_v30  ;;  %v982_v29 = vmax.f32 %v980_v32, %v2326_v46  ;;  %v1331_v27 = vadd.f32 1.0, %v2349_v44 }
  0xe1   :  { %v893_v6 = vadd.f32 %v892_v62, %v891_v23  ;;  %v1332_v55 = vadd.f32 1.0, %v2354_v59  ;;  %v2375_v51 = vrot.slane %v908_v0, %v1896_v18  ;;  %v2378_v54 = vrot.slane %v908_v0, %v1898_v19 }
  0xe2   :  { %v888_v8 = vadd.f32 %v887_v40, %v886_v26  ;;  %v983_v52 = vmax.f32 %v981_v56, %v2333_v45  ;;  %v984_v49 = vmax.f32 %v982_v29, %v2335_v31  ;;  %v2381_v57 = vrot.slane %v908_v0, %v1900_v20 }
  0xe3   :  { %v894_v21 = vrot.slane %v893_v6, 2  ;;  %v2384_v2 = vrot.slane %v908_v0, %v2651_v61  ;;  %v2391_v50 = vrot.slane %v909_v58, %v1888_v10  ;;  %v2394_v39 = vrot.slane %v909_v58, %v1890_v11 }
  0xe4   :  { %v889_v3 = vrot.slane %v888_v8, 1  ;;  %v985_v9 = vmax.f32 %v983_v52, %v2356_v34  ;;  %v2388_v28 = vmax.f32 %v984_v49, %v2358_v63  ;;  %v106_v53 = vmul.f32 %v1331_v27, %v1331_v27 }
  0xe5   :  { %v895_v60 = vadd.f32 %v894_v21, %v893_v6  ;;  %v107_v22 = vmul.f32 %v1332_v55, %v1332_v55  ;;  %v1333_v23 = vadd.f32 0.7777778, %v2349_v44 }
  0xe6   :  { %v2397_v43 = vmax.f32 %v985_v9, %v2360_v17  ;;  %v988_v0 = vsub.f32 %v2277_v7, %v2388_v28  ;;  %v1004_v26 = vsub.f32 %v2281_v47, %v2388_v28  ;;  %v890_v41 = vadd.f32 %v889_v3, %v888_v8 }
  0xe7   :  { %v896_v32 = vrot.slane %v895_v60, 1  ;;  %v1020_v62 = vsub.f32 %v2290_v12, %v2388_v28  ;;  %v1036_v40 = vsub.f32 %v2295_v37, %v2388_v28  ;;  %v1052_v12 = vsub.f32 %v2302_v25, %v2388_v28 }
  0xe8   :  { %v989_v56 = vsub.f32 %v2279_v1, %v2397_v43  ;;  %v990_v29 = vmul.f32 1.442695, %v988_v0  ;;  %v1005_v7 = vsub.f32 %v2284_v4, %v2397_v43  ;;  %v1006_v6 = vmul.f32 1.442695, %v1004_v26 }
  0xe9   :  { %v897_v58 = vadd.f32 %v896_v32, %v895_v60  ;;  %v1021_v47 = vsub.f32 %v2293_v35, %v2397_v43  ;;  %v1037_v27 = vsub.f32 %v2300_v13, %v2397_v43  ;;  %v1022_v8 = vmul.f32 1.442695, %v1020_v62 }
  0xea   :  { %1521 = vpow2.f32 %v990_v29  ;;  %v992_v37 = vmul.f32 1.442695, %v989_v56  ;;  %v1008_v55 = vmul.f32 1.442695, %v1005_v7  ;;  %v1334_v4 = vadd.f32 0.7777778, %v2354_v59 }
  0xeb   :  { %v900_v1 = vsel %vm363_vm1, %v897_v58, %v890_v41  ;;  %1523 = vpow2.f32 %v1006_v6  ;;  %v1024_v52 = vmul.f32 1.442695, %v1021_v47  ;;  %v1038_v35 = vmul.f32 1.442695, %v1036_v40 }
  0xec   :  { %901 = vrot.lane.b32.xlu0 %v900_v1, %s1754_s7  ;;  %1525 = vpow2.f32 %v992_v37  ;;  %v1053_v13 = vsub.f32 %v2306_v48, %v2397_v43  ;;  %v1068_v25 = vsub.f32 %v2316_v5, %v2388_v28  ;;  %v1040_v49 = vmul.f32 1.442695, %v1037_v27 }
  0xed   :  { %1527 = vpow2.f32 %v1008_v55  ;;  %v1069_v21 = vsub.f32 %v2318_v42, %v2397_v43  ;;  %v2427_v3 = vmul.f32 -2.0, %v106_v53  ;;  %v1054_v9 = vmul.f32 1.442695, %v1052_v12 }
  0xee   :  { %1529 = vpow2.f32 %v1022_v8  ;;  %v1084_v60 = vsub.f32 %v2322_v16, %v2388_v28  ;;  %v112_v0 = vmul.f32 %v1333_v23, %v1333_v23  ;;  %v1056_v26 = vmul.f32 1.442695, %v1053_v13 }
  0xef   :  { %1531 = vpow2.f32 %v1024_v52  ;;  %v1085_v48 = vsub.f32 %v2324_v30, %v2397_v43  ;;  %v2433_v41 = vmul.f32 -2.0, %v107_v22  ;;  %v1070_v5 = vmul.f32 1.442695, %v1068_v25 }
  0xf0   :  { %1533 = vpow2.f32 %v1038_v35  ;;  %v1100_v42 = vsub.f32 %v2326_v46, %v2388_v28  ;;  %v1335_v53 = vadd.f32 0.5555556, %v2349_v44  ;;  %v1072_v32 = vmul.f32 1.442695, %v1069_v21 }
  0xf1   :  { %1535 = vpow2.f32 %v1040_v49  ;;  %v1101_v16 = vsub.f32 %v2333_v45, %v2397_v43  ;;  %v2440_v23 = vmul.f32 %v1334_v4, %v1334_v4  ;;  %v1086_v62 = vmul.f32 1.442695, %v1084_v60 }
  0xf2   :  { %1537 = vpow2.f32 %v1054_v9  ;;  %v1116_v30 = vsub.f32 %v2335_v31, %v2388_v28  ;;  %v2444_v22 = vmul.f32 -2.0, %v112_v0  ;;  %v1088_v40 = vmul.f32 1.442695, %v1085_v48 }
  0xf3   :  { %1539 = vpow2.f32 %v1056_v26  ;;  %v1117_v46 = vsub.f32 %v2356_v34, %v2397_v43  ;;  %v1132_v56 = vsub.f32 %v2358_v63, %v2388_v28  ;;  %v1102_v45 = vmul.f32 1.442695, %v1100_v42 }
  0xf4   :  { %v1522_v29 = vpop.eup %1521  ;;  %1541 = vpow2.f32 %v1070_v5  ;;  %v1336_v7 = vadd.f32 0.5555556, %v2354_v59  ;;  %v2451_v6 = vmul.f32 %v1335_v53, %v1335_v53  ;;  %v1104_v47 = vmul.f32 1.442695, %v1101_v16 }
  0xf5   :  { %v1524_v58 = vpop.eup %1523  ;;  %v1000_v31 = vmul.f32 %v1522_v29, %v2338_v38  ;;  %1543 = vpow2.f32 %v1072_v32  ;;  %v1133_v27 = vsub.f32 %v2360_v17, %v2397_v43  ;;  %v1118_v63 = vmul.f32 1.442695, %v1116_v30 }
  0xf6   :  { %v1526_v12 = vpop.eup %1525  ;;  %v1010_v34 = vadd.f32 %v1524_v58, %v1522_v29  ;;  %v1016_v37 = vmul.f32 %v1524_v58, %v2341_v33  ;;  %1545 = vpow2.f32 %v1086_v62  ;;  %v1120_v8 = vmul.f32 1.442695, %v1117_v46 }
  0xf7   :  { %v1528_v28 = vpop.eup %1527  ;;  %v1001_v55 = vmul.f32 %v1526_v12, %v2338_v38  ;;  %1547 = vpow2.f32 %v1088_v40  ;;  %v1134_v1 = vmul.f32 1.442695, %v1132_v56  ;;  %v1136_v49 = vmul.f32 1.442695, %v1133_v27 }
  0xf8   :  { %v1530_v52 = vpop.eup %1529  ;;  %v1011_v4 = vadd.f32 %v1528_v28, %v1526_v12  ;;  %v1017_v35 = vmul.f32 %v1528_v28, %v2341_v33  ;;  %v1018_v13 = vadd.f32 %v1016_v37, %v1000_v31  ;;  %1549 = vpow2.f32 %v1102_v45 }
  0xf9   :  { %v1532_v25 = vpop.eup %1531  ;;  %v1026_v17 = vadd.f32 %v1530_v52, %v1010_v34  ;;  %v1032_v43 = vmul.f32 %v1530_v52, %v2365_v36  ;;  %1551 = vpow2.f32 %v1104_v47  ;;  %v119_v45 = vmul.f32 %v1336_v7, %v1336_v7 }
  0xfa   :  { %v1534_v21 = vpop.eup %1533  ;;  %v1019_v9 = vadd.f32 %v1017_v35, %v1001_v55  ;;  %v1027_v60 = vadd.f32 %v1532_v25, %v1011_v4  ;;  %v1033_v38 = vmul.f32 %v1532_v25, %v2365_v36  ;;  %1553 = vpow2.f32 %v1118_v63 }
  0xfb   :  { %v1536_v0 = vpop.eup %1535  ;;  %v1034_v26 = vadd.f32 %v1032_v43, %v1018_v13  ;;  %v1042_v48 = vadd.f32 %v1534_v21, %v1026_v17  ;;  %v1048_v5 = vmul.f32 %v1534_v21, %v2368_v24  ;;  %1555 = vpow2.f32 %v1120_v8 }
  0xfc   :  { %v1538_v33 = vpop.eup %1537  ;;  %v1035_v42 = vadd.f32 %v1033_v38, %v1019_v9  ;;  %v1043_v53 = vadd.f32 %v1536_v0, %v1027_v60  ;;  %v1049_v32 = vmul.f32 %v1536_v0, %v2368_v24  ;;  %1557 = vpow2.f32 %v1134_v1 }
  0xfd   :  { %v1540_v16 = vpop.eup %1539  ;;  %v1050_v62 = vadd.f32 %v1048_v5, %v1034_v26  ;;  %v1058_v30 = vadd.f32 %v1538_v33, %v1042_v48  ;;  %v1064_v40 = vmul.f32 %v1538_v33, %v2375_v51  ;;  %1559 = vpow2.f32 %v1136_v49 }
  0xfe   :  { %v1542_v36 = vpop.eup %1541  ;;  %v1051_v46 = vadd.f32 %v1049_v32, %v1035_v42  ;;  %v1059_v56 = vadd.f32 %v1540_v16, %v1043_v53  ;;  %v1065_v29 = vmul.f32 %v1540_v16, %v2375_v51  ;;  %v1337_v24 = vadd.f32 0.33333334, %v2349_v44 }
  0xff   :  { %v1544_v58 = vpop.eup %1543  ;;  %v1066_v31 = vadd.f32 %v1064_v40, %v1050_v62  ;;  %v1074_v47 = vadd.f32 %v1542_v36, %v1058_v30  ;;  %v1080_v27 = vmul.f32 %v1542_v36, %v2378_v54  ;;  %v1338_v28 = vadd.f32 0.33333334, %v2354_v59 }
 0x100   :  { %v1546_v12 = vpop.eup %1545  ;;  %v1067_v34 = vadd.f32 %v1065_v29, %v1051_v46  ;;  %v1075_v37 = vadd.f32 %v1544_v58, %v1059_v56  ;;  %v1081_v63 = vmul.f32 %v1544_v58, %v2378_v54  ;;  %v1339_v7 = vadd.f32 0.11111111, %v2349_v44 }
 0x101   :  { %v1548_v55 = vpop.eup %1547  ;;  %v1082_v8 = vadd.f32 %v1080_v27, %v1066_v31  ;;  %v1090_v1 = vadd.f32 %v1546_v12, %v1074_v47  ;;  %v1096_v51 = vmul.f32 %v1546_v12, %v2381_v57  ;;  %v1340_v25 = vadd.f32 0.11111111, %v2354_v59 }
 0x102   :  { %v1550_v52 = vpop.eup %1549  ;;  %v1083_v4 = vadd.f32 %v1081_v63, %v1067_v34  ;;  %v1091_v35 = vadd.f32 %v1548_v55, %v1075_v37  ;;  %v1097_v13 = vmul.f32 %v1548_v55, %v2381_v57  ;;  %v2474_v54 = vmul.f32 -2.0, %v2440_v23 }
 0x103   :  { %v1552_v17 = vpop.eup %1551  ;;  %v1106_v43 = vadd.f32 %v1550_v52, %v1090_v1  ;;  %v124_v49 = vmul.f32 %v1337_v24, %v1337_v24  ;;  %v1341_v21 = vadd.f32 -0.11111111, %v2349_v44  ;;  %v1098_v60 = vadd.f32 %v1096_v51, %v1082_v8 }
 0x104   :  { %v1554_v9 = vpop.eup %1553  ;;  %v1107_v38 = vadd.f32 %v1552_v17, %v1091_v35  ;;  %v1112_v0 = vmul.f32 %v1550_v52, %v2384_v2  ;;  %v125_v26 = vmul.f32 %v1338_v28, %v1338_v28  ;;  %v1099_v5 = vadd.f32 %v1097_v13, %v1083_v4 }
 0x105   :  { %v1556_v48 = vpop.eup %1555  ;;  %v1113_v57 = vmul.f32 %v1552_v17, %v2384_v2  ;;  %v1122_v33 = vadd.f32 %v1554_v9, %v1106_v43  ;;  %v2480_v42 = vmul.f32 -2.0, %v2451_v6  ;;  %v2482_v32 = vmul.f32 -2.0, %v119_v45 }
 0x106   :  { %v1558_v53 = vpop.eup %1557  ;;  %v1123_v23 = vadd.f32 %v1556_v48, %v1107_v38  ;;  %v130_v16 = vmul.f32 %v1339_v7, %v1339_v7  ;;  %v131_v62 = vmul.f32 %v1340_v25, %v1340_v25  ;;  %v2484_v36 = vmul.f32 -2.0, %v124_v49 }
 0x107   :  { %v1560_v30 = vpop.eup %1559  ;;  %v1138_v40 = vadd.f32 %v1558_v53, %v1122_v33  ;;  %v1342_v46 = vadd.f32 -0.11111111, %v2354_v59  ;;  %v136_v56 = vmul.f32 %v1341_v21, %v1341_v21  ;;  %v1114_v29 = vadd.f32 %v1112_v0, %v1098_v60 }
 0x108   :  { %v1128_v2 = vmul.f32 %v1554_v9, %v2391_v50  ;;  %v1139_v58 = vadd.f32 %v1560_v30, %v1123_v23  ;;  %v2488_v31 = vmul.f32 -2.0, %v125_v26  ;;  %v1115_v6 = vadd.f32 %v1113_v57, %v1099_v5 }
 0x109   :  { %v1129_v47 = vmul.f32 %v1556_v48, %v2391_v50  ;;  %1561 = vrcp.f32 %v1138_v40  ;;  %v1343_v45 = vadd.f32 -0.33333334, %v2349_v44  ;;  %v2492_v27 = vmul.f32 -2.0, %v130_v16 }
 0x10a   :  { %1563 = vrcp.f32 %v1139_v58  ;;  %v2494_v24 = vmul.f32 -2.0, %v131_v62  ;;  %v1344_v12 = vadd.f32 -0.33333334, %v2354_v59  ;;  %v137_v34 = vmul.f32 %v1342_v46, %v1342_v46 }
 0x10b   :  { %v2497_v37 = vmul.f32 -2.0, %v136_v56  ;;  %v1345_v63 = vadd.f32 -0.5555556, %v2349_v44  ;;  %v1346_v28 = vadd.f32 -0.5555556, %v2354_v59  ;;  %v1130_v55 = vadd.f32 %v1128_v2, %v1114_v29 }
 0x10c   :  { %v1144_v50 = vmul.f32 %v1558_v53, %v2394_v39  ;;  %v164_v8 = vmax.f32 %v2427_v3, %v2444_v22  ;;  %v165_v1 = vmax.f32 %v2433_v41, %v2474_v54  ;;  %v1131_v51 = vadd.f32 %v1129_v47, %v1115_v6 }
 0x10d   :  { %v1145_v7 = vmul.f32 %v1560_v30, %v2394_v39  ;;  %v142_v52 = vmul.f32 %v1343_v45, %v1343_v45  ;;  %v1347_v4 = vadd.f32 -0.7777778, %v2349_v44  ;;  %v143_v35 = vmul.f32 %v1344_v12, %v1344_v12 }
 0x10e   :  { %v1348_v13 = vadd.f32 -0.7777778, %v2354_v59  ;;  %v166_v25 = vmax.f32 %v164_v8, %v2480_v42  ;;  %v167_v17 = vmax.f32 %v165_v1, %v2482_v32  ;;  %v2511_v43 = vmul.f32 -2.0, %v137_v34 }
 0x10f   :  { %v148_v49 = vmul.f32 %v1345_v63, %v1345_v63  ;;  %v149_v21 = vmul.f32 %v1346_v28, %v1346_v28  ;;  %v1349_v9 = vadd.f32 -1.0, %v2349_v44  ;;  %v1146_v60 = vadd.f32 %v1144_v50, %v1130_v55 }
 0x110   :  { %v1350_v38 = vadd.f32 -1.0, %v2354_v59  ;;  %v168_v39 = vmax.f32 %v166_v25, %v2484_v36  ;;  %v169_v0 = vmax.f32 %v167_v17, %v2488_v31  ;;  %v1147_v26 = vadd.f32 %v1145_v7, %v1131_v51 }
 0x111   :  { %v2517_v48 = vmul.f32 -2.0, %v142_v52  ;;  %v154_v5 = vmul.f32 %v1347_v4, %v1347_v4  ;;  %v2519_v57 = vmul.f32 -2.0, %v143_v35  ;;  %v155_v33 = vmul.f32 %v1348_v13, %v1348_v13 }
 0x112   :  { %v170_v53 = vmax.f32 %v168_v39, %v2492_v27  ;;  %v171_v23 = vmax.f32 %v169_v0, %v2494_v24  ;;  %v2523_v44 = vmul.f32 -2.0, %v148_v49  ;;  %v2525_v59 = vmul.f32 -2.0, %v149_v21 }
 0x113   :  { %v1562_v16 = vpop.eup %1561  ;;  %v160_v62 = vmul.f32 %v1349_v9, %v1349_v9  ;;  %v161_v46 = vmul.f32 %v1350_v38, %v1350_v38  ;;  %v2529_v58 = vmul.f32 -2.0, %v154_v5  ;;  %v2532_v47 = vmul.f32 -2.0, %v155_v33 }
 0x114   :  { %v1564_v30 = vpop.eup %1563  ;;  %v1149_v40 = vmul.f32 %v1562_v16, %v1146_v60  ;;  %v172_v56 = vmax.f32 %v170_v53, %v2497_v37  ;;  %v173_v29 = vmax.f32 %v171_v23, %v2511_v43 }
 0x115   :  { %v1151_v2 = vmul.f32 %v1564_v30, %v1147_v26  ;;  %v2537_v28 = vmul.f32 -2.0, %v160_v62  ;;  %v2539_v50 = vmul.f32 -2.0, %v161_v46 }
 0x116   :  { %v1152_v6 = vsel %vm366_vm3, %v1149_v40, 0.0  ;;  %v174_v45 = vmax.f32 %v172_v56, %v2517_v48  ;;  %v175_v12 = vmax.f32 %v173_v29, %v2519_v57 }
 0x117   :  { %v1153_v34 = vrot.slane %v1152_v6, 4  ;;  %v1159_v63 = vsel %vm366_vm3, %v1151_v2, 0.0 }
 0x118   :  { %v1160_v55 = vrot.slane %v1159_v63, 4  ;;  %v176_v8 = vmax.f32 %v174_v45, %v2523_v44  ;;  %v177_v1 = vmax.f32 %v175_v12, %v2525_v59 }
 0x119   :  { %v1154_v51 = vadd.f32 %v1153_v34, %v1152_v6 }
 0x11a   :  { %v1161_v7 = vadd.f32 %v1160_v55, %v1159_v63  ;;  %v178_v52 = vmax.f32 %v176_v8, %v2529_v58  ;;  %v179_v4 = vmax.f32 %v177_v1, %v2532_v47 }
 0x11b   :  { %v1155_v35 = vrot.slane %v1154_v51, 2 }
 0x11c   :  { %v1162_v13 = vrot.slane %v1161_v7, 2  ;;  %v2546_v25 = vmax.f32 %v178_v52, %v2537_v28  ;;  %v2549_v17 = vmax.f32 %v179_v4, %v2539_v50 }
 0x11d   :  { %v1156_v49 = vadd.f32 %v1155_v35, %v1154_v51 }
 0x11e   :  { %v1163_v21 = vadd.f32 %v1162_v13, %v1161_v7  ;;  %v182_v9 = vsub.f32 %v2427_v3, %v2546_v25  ;;  %v183_v60 = vsub.f32 %v2433_v41, %v2549_v17  ;;  %v198_v38 = vsub.f32 %v2444_v22, %v2546_v25 }
 0x11f   :  { %v1157_v39 = vrot.slane %v1156_v49, 1  ;;  %v199_v0 = vsub.f32 %v2474_v54, %v2549_v17  ;;  %v214_v26 = vsub.f32 %v2480_v42, %v2546_v25  ;;  %v215_v5 = vsub.f32 %v2482_v32, %v2549_v17  ;;  %v2570_v42 = vld [vmem:[%s2641_s4] sm:$0xff] }
 0x120   :  { %v1164_v33 = vrot.slane %v1163_v21, 1  ;;  %v184_v53 = vmul.f32 1.442695, %v182_v9  ;;  %v186_v23 = vmul.f32 1.442695, %v183_v60  ;;  %v230_v3 = vsub.f32 %v2484_v36, %v2546_v25 }
 0x121   :  { %v1158_v41 = vadd.f32 %v1157_v39, %v1156_v49  ;;  %v200_v16 = vmul.f32 1.442695, %v198_v38  ;;  %v202_v62 = vmul.f32 1.442695, %v199_v0  ;;  %v216_v30 = vmul.f32 1.442695, %v214_v26 }
 0x122   :  { %v1165_v22 = vadd.f32 %v1164_v33, %v1163_v21  ;;  %1565 = vpow2.f32 %v184_v53  ;;  %v231_v54 = vsub.f32 %v2488_v31, %v2549_v17  ;;  %v218_v32 = vmul.f32 1.442695, %v215_v5 }
 0x123   :  { %1567 = vpow2.f32 %v186_v23  ;;  %v246_v40 = vsub.f32 %v2492_v27, %v2546_v25  ;;  %v247_v36 = vsub.f32 %v2494_v24, %v2549_v17  ;;  %v232_v56 = vmul.f32 1.442695, %v230_v3 }
 0x124   :  { %v1168_v46 = vsel %vm363_vm1, %v1165_v22, %v1158_v41  ;;  %1569 = vpow2.f32 %v200_v16  ;;  %v262_v31 = vsub.f32 %v2497_v37, %v2546_v25  ;;  %v234_v29 = vmul.f32 1.442695, %v231_v54 }
 0x125   :  { %1169 = vrot.lane.b32.xlu1 %v1168_v46, %s1758_s20  ;;  %1571 = vpow2.f32 %v202_v62  ;;  %v263_v2 = vsub.f32 %v2511_v43, %v2549_v17  ;;  %v193_v27 = vrot.slane %v2570_v42, %v1888_v10  ;;  %v248_v6 = vmul.f32 1.442695, %v246_v40 }
 0x126   :  { %1573 = vpow2.f32 %v216_v30  ;;  %v278_v24 = vsub.f32 %v2517_v48, %v2546_v25  ;;  %v209_v45 = vrot.slane %v2570_v42, %v1890_v11  ;;  %v250_v37 = vmul.f32 1.442695, %v247_v36 }
 0x127   :  { %1575 = vpow2.f32 %v218_v32  ;;  %v279_v12 = vsub.f32 %v2519_v57, %v2549_v17  ;;  %v225_v34 = vrot.slane %v2570_v42, %v1892_v14  ;;  %v264_v43 = vmul.f32 1.442695, %v262_v31 }
 0x128   :  { %1577 = vpow2.f32 %v232_v56  ;;  %v294_v63 = vsub.f32 %v2523_v44, %v2546_v25  ;;  %v241_v48 = vrot.slane %v2570_v42, %v1894_v15  ;;  %v266_v55 = vmul.f32 1.442695, %v263_v2 }
 0x129   :  { %1579 = vpow2.f32 %v234_v29  ;;  %v295_v8 = vsub.f32 %v2525_v59, %v2549_v17  ;;  %v280_v1 = vmul.f32 1.442695, %v278_v24  ;;  %v310_v57 = vsub.f32 %v2529_v58, %v2546_v25 }
 0x12a   :  { %1581 = vpow2.f32 %v248_v6  ;;  %v311_v51 = vsub.f32 %v2532_v47, %v2549_v17  ;;  %v257_v44 = vrot.slane %v2570_v42, %v1896_v18  ;;  %v282_v7 = vmul.f32 1.442695, %v279_v12 }
 0x12b   :  { %1583 = vpow2.f32 %v250_v37  ;;  %v326_v52 = vsub.f32 %v2537_v28, %v2546_v25  ;;  %v273_v59 = vrot.slane %v2570_v42, %v1898_v19  ;;  %v296_v35 = vmul.f32 1.442695, %v294_v63 }
 0x12c   :  { %v1566_v4 = vpop.eup %1565  ;;  %1585 = vpow2.f32 %v264_v43  ;;  %v327_v58 = vsub.f32 %v2539_v50, %v2549_v17  ;;  %v2611_v47 = vrot.slane %v2570_v42, %v1900_v20  ;;  %v298_v21 = vmul.f32 1.442695, %v295_v8 }
 0x12d   :  { %v1568_v13 = vpop.eup %1567  ;;  %v194_v49 = vmul.f32 %v1566_v4, %v193_v27  ;;  %1587 = vpow2.f32 %v266_v55  ;;  %v312_v28 = vmul.f32 1.442695, %v310_v57  ;;  %v314_v25 = vmul.f32 1.442695, %v311_v51 }
 0x12e   :  { %v1570_v9 = vpop.eup %1569  ;;  %v195_v60 = vmul.f32 %v1568_v13, %v193_v27  ;;  %1589 = vpow2.f32 %v280_v1  ;;  %v328_v26 = vmul.f32 1.442695, %v326_v52  ;;  %v330_v33 = vmul.f32 1.442695, %v327_v58 }
 0x12f   :  { %v1572_v38 = vpop.eup %1571  ;;  %v204_v39 = vadd.f32 %v1570_v9, %v1566_v4  ;;  %v210_v0 = vmul.f32 %v1570_v9, %v209_v45  ;;  %1591 = vpow2.f32 %v282_v7  ;;  %v103_v4 = vld [vmem:[%s2641_s4 + $0x8] sm:$0x3] }
 0x130   :  { %v1574_v5 = vpop.eup %1573  ;;  %v205_v50 = vadd.f32 %v1572_v38, %v1568_v13  ;;  %v211_v17 = vmul.f32 %v1572_v38, %v209_v45  ;;  %1593 = vpow2.f32 %v296_v35 }
 0x131   :  { %v1576_v53 = vpop.eup %1575  ;;  %v212_v23 = vadd.f32 %v210_v0, %v194_v49  ;;  %v220_v3 = vadd.f32 %v1574_v5, %v204_v39  ;;  %v226_v41 = vmul.f32 %v1574_v5, %v225_v34  ;;  %1595 = vpow2.f32 %v298_v21 }
 0x132   :  { %v1578_v16 = vpop.eup %1577  ;;  %v213_v62 = vadd.f32 %v211_v17, %v195_v60  ;;  %v221_v22 = vadd.f32 %v1576_v53, %v205_v50  ;;  %v227_v30 = vmul.f32 %v1576_v53, %v225_v34  ;;  %1597 = vpow2.f32 %v312_v28 }
 0x133   :  { %v1580_v54 = vpop.eup %1579  ;;  %v228_v32 = vadd.f32 %v226_v41, %v212_v23  ;;  %v236_v40 = vadd.f32 %v1578_v16, %v220_v3  ;;  %v242_v36 = vmul.f32 %v1578_v16, %v241_v48  ;;  %1599 = vpow2.f32 %v314_v25 }
 0x134   :  { %v1582_v46 = vpop.eup %1581  ;;  %v229_v56 = vadd.f32 %v227_v30, %v213_v62  ;;  %v237_v31 = vadd.f32 %v1580_v54, %v221_v22  ;;  %v243_v29 = vmul.f32 %v1580_v54, %v241_v48  ;;  %1601 = vpow2.f32 %v328_v26 }
 0x135   :  { %v1584_v2 = vpop.eup %1583  ;;  %v244_v27 = vadd.f32 %v242_v36, %v228_v32  ;;  %v252_v6 = vadd.f32 %v1582_v46, %v236_v40  ;;  %v258_v24 = vmul.f32 %v1582_v46, %v257_v44  ;;  %1603 = vpow2.f32 %v330_v33 }
 0x136   :  { %v1586_v45 = vpop.eup %1585  ;;  %v245_v37 = vadd.f32 %v243_v29, %v229_v56  ;;  %v253_v12 = vadd.f32 %v1584_v2, %v237_v31  ;;  %v259_v34 = vmul.f32 %v1584_v2, %v257_v44  ;;  %v305_v48 = vrot.slane %v2570_v42, %v2651_v61 }
 0x137   :  { %v1588_v43 = vpop.eup %1587  ;;  %v260_v63 = vadd.f32 %v258_v24, %v244_v27  ;;  %v268_v55 = vadd.f32 %v1586_v45, %v252_v6  ;;  %v274_v8 = vmul.f32 %v1586_v45, %v273_v59  ;;  %v321_v39 = vrot.slane %v103_v4, %v1888_v10 }
 0x138   :  { %v1590_v1 = vpop.eup %1589  ;;  %v261_v57 = vadd.f32 %v259_v34, %v245_v37  ;;  %v269_v51 = vadd.f32 %v1588_v43, %v253_v12  ;;  %v275_v7 = vmul.f32 %v1588_v43, %v273_v59 }
 0x139   :  { %v1592_v52 = vpop.eup %1591  ;;  %v276_v35 = vadd.f32 %v274_v8, %v260_v63  ;;  %v284_v58 = vadd.f32 %v1590_v1, %v268_v55  ;;  %v290_v44 = vmul.f32 %v1590_v1, %v2611_v47  ;;  %v633_v1 = vpop.permute.xlu0 %632 }
 0x13a   :  { %v1594_v13 = vpop.eup %1593  ;;  %v277_v49 = vadd.f32 %v275_v7, %v261_v57  ;;  %v285_v21 = vadd.f32 %v1592_v52, %v269_v51  ;;  %v291_v9 = vmul.f32 %v1592_v52, %v2611_v47  ;;  %v337_v47 = vrot.slane %v103_v4, %v1890_v11 }
 0x13b   :  { %v1596_v60 = vpop.eup %1595  ;;  %v300_v28 = vadd.f32 %v1594_v13, %v284_v58  ;;  %v292_v25 = vadd.f32 %v290_v44, %v276_v35  ;;  %v306_v42 = vmul.f32 %v1594_v13, %v305_v48 }
 0x13c   :  { %v1598_v59 = vpop.eup %1597  ;;  %v301_v38 = vadd.f32 %v1596_v60, %v285_v21  ;;  %v293_v26 = vadd.f32 %v291_v9, %v277_v49  ;;  %v307_v5 = vmul.f32 %v1596_v60, %v305_v48 }
 0x13d   :  { %v1600_v0 = vpop.eup %1599  ;;  %v316_v50 = vadd.f32 %v1598_v59, %v300_v28  ;;  %v308_v3 = vadd.f32 %v306_v42, %v292_v25  ;;  %v322_v41 = vmul.f32 %v1598_v59, %v321_v39 }
 0x13e   :  { %v1602_v17 = vpop.eup %1601  ;;  %v317_v33 = vadd.f32 %v1600_v0, %v301_v38  ;;  %v309_v62 = vadd.f32 %v307_v5, %v293_v26  ;;  %v323_v22 = vmul.f32 %v1600_v0, %v321_v39 }
 0x13f   :  { %v1604_v53 = vpop.eup %1603  ;;  %v332_v23 = vadd.f32 %v1602_v17, %v316_v50  ;;  %v324_v30 = vadd.f32 %v322_v41, %v308_v3  ;;  %v338_v54 = vmul.f32 %v1602_v17, %v337_v47 }
 0x140   :  { %v333_v16 = vadd.f32 %v1604_v53, %v317_v33  ;;  %v325_v32 = vadd.f32 %v323_v22, %v309_v62  ;;  %v339_v40 = vmul.f32 %v1604_v53, %v337_v47 }
 0x141   :  { %1605 = vrcp.f32 %v332_v23  ;;  %v340_v36 = vadd.f32 %v338_v54, %v324_v30 }
 0x142   :  { %1607 = vrcp.f32 %v333_v16  ;;  %v341_v46 = vadd.f32 %v339_v40, %v325_v32 }
 0x14b   :  { %v1606_v56 = vpop.eup %1605 }
 0x14c   :  { %v1608_v31 = vpop.eup %1607  ;;  %v343_v29 = vmul.f32 %v1606_v56, %v340_v36 }
 0x14d   :  { %v345_v2 = vmul.f32 %v1608_v31, %v341_v46 }
 0x14e   :  { %v347_v27 = vsel %vm346_vm4, %v343_v29, 0.0 }
 0x14f   :  { %v348_v6 = vrot.slane %v347_v27, 4  ;;  %v354_v24 = vsel %vm346_vm4, %v345_v2, 0.0 }
 0x150   :  { %v355_v45 = vrot.slane %v354_v24, 4 }
 0x151   :  { %v349_v37 = vadd.f32 %v348_v6, %v347_v27 }
 0x152   :  { %v356_v12 = vadd.f32 %v355_v45, %v354_v24 }
 0x153   :  { %v350_v34 = vrot.slane %v349_v37, 2 }
 0x154   :  { %v357_v43 = vrot.slane %v356_v12, 2 }
 0x155   :  { %v351_v63 = vadd.f32 %v350_v34, %v349_v37 }
 0x156   :  { %v358_v55 = vadd.f32 %v357_v43, %v356_v12 }
 0x157   :  { %v352_v8 = vrot.slane %v351_v63, 1 }
 0x158   :  { %v359_v57 = vrot.slane %v358_v55, 1 }
 0x159   :  { %v353_v51 = vadd.f32 %v352_v8, %v351_v63 }
 0x15a   :  { %v360_v7 = vadd.f32 %v359_v57, %v358_v55 }
 0x15c   :  { %v364_v48 = vsel %vm363_vm1, %v360_v7, %v353_v51  ;;  %v1175_v7 = vld [vmem:[#allocation10] sm:$0xff] }
 0x15d   :  { %367 = vst.msk [vmem:[#allocation2] sm:$0x3] %vm366_vm3, %v364_v48 }
 0x15e   :  { %v902_v52 = vpop.permute.xlu0 %901  ;;  %636 = vst.msk [vmem:[#allocation2] sm:$0x3] %vm635_vm5, %v633_v1 }
 0x15f   :  { %905 = vst.msk [vmem:[#allocation2] sm:$0x3] %vm904_vm6, %v902_v52 }
 0x197   :  { %v1170_v4 = vpop.permute.xlu1 %1169 }
 0x198   :  { %1173 = vst.msk [vmem:[#allocation2] sm:$0x3] %vm1172_vm7, %v1170_v4  ;;  %v1223_v4 = vrot.slane %v1175_v7, %v1888_v10 }
 0x19f   :  { %v1174_v35 = vld [vmem:[#allocation2] sm:$0x3] }
 0x1a0   :  { %v1411_v58 = vadd.f32 1.0, %v1174_v35  ;;  %v1412_v44 = vadd.f32 0.7777778, %v1174_v35  ;;  %v1413_v13 = vadd.f32 0.5555556, %v1174_v35  ;;  %v1420_v22 = vadd.f32 -1.0, %v1174_v35 }
 0x1a1   :  { %v1414_v49 = vadd.f32 0.33333334, %v1174_v35  ;;  %v1415_v28 = vadd.f32 0.11111111, %v1174_v35  ;;  %v1416_v42 = vadd.f32 -0.11111111, %v1174_v35 }
 0x1a2   :  { %v1178_v21 = vmul.f32 %v1411_v58, %v1411_v58  ;;  %v1181_v9 = vmul.f32 %v1412_v44, %v1412_v44  ;;  %v1184_v60 = vmul.f32 %v1413_v13, %v1413_v13  ;;  %v1417_v26 = vadd.f32 -0.33333334, %v1174_v35 }
 0x1a3   :  { %v1187_v38 = vmul.f32 %v1414_v49, %v1414_v49  ;;  %v1190_v0 = vmul.f32 %v1415_v28, %v1415_v28  ;;  %v1193_v17 = vmul.f32 %v1416_v42, %v1416_v42  ;;  %v1418_v33 = vadd.f32 -0.5555556, %v1174_v35 }
 0x1a4   :  { %v1179_v59 = vmul.f32 -2.0, %v1178_v21  ;;  %v1182_v25 = vmul.f32 -2.0, %v1181_v9  ;;  %v1185_v39 = vmul.f32 -2.0, %v1184_v60  ;;  %v1196_v3 = vmul.f32 %v1417_v26, %v1417_v26 }
 0x1a5   :  { %v1188_v50 = vmul.f32 -2.0, %v1187_v38  ;;  %v1191_v23 = vmul.f32 -2.0, %v1190_v0  ;;  %v1419_v41 = vadd.f32 -0.7777778, %v1174_v35  ;;  %v1194_v47 = vmul.f32 -2.0, %v1193_v17 }
 0x1a6   :  { %v1207_v5 = vmax.f32 %v1179_v59, %v1182_v25  ;;  %v1199_v62 = vmul.f32 %v1418_v33, %v1418_v33  ;;  %v1197_v54 = vmul.f32 -2.0, %v1196_v3  ;;  %v1205_v46 = vmul.f32 %v1420_v22, %v1420_v22 }
 0x1a7   :  { %v1202_v32 = vmul.f32 %v1419_v41, %v1419_v41  ;;  %v1233_v44 = vrot.slane %v1175_v7, %v1890_v11  ;;  %v1243_v9 = vrot.slane %v1175_v7, %v1892_v14  ;;  %v1263_v33 = vrot.slane %v1175_v7, %v1896_v18 }
 0x1a8   :  { %v1208_v53 = vmax.f32 %v1207_v5, %v1185_v39  ;;  %v1200_v36 = vmul.f32 -2.0, %v1199_v62  ;;  %v1206_v2 = vmul.f32 -2.0, %v1205_v46  ;;  %v1273_v41 = vrot.slane %v1175_v7, %v1898_v19  ;;  %v1176_v19 = vld [vmem:[#allocation10 + $0x8] sm:$0x3] }
 0x1a9   :  { %v1203_v31 = vmul.f32 -2.0, %v1202_v32 }
 0x1aa   :  { %v1209_v16 = vmax.f32 %v1208_v53, %v1188_v50 }
 0x1ac   :  { %v1210_v30 = vmax.f32 %v1209_v16, %v1191_v23 }
 0x1ae   :  { %v1211_v40 = vmax.f32 %v1210_v30, %v1194_v47 }
 0x1b0   :  { %v1212_v56 = vmax.f32 %v1211_v40, %v1197_v54  ;;  %v1283_v40 = vrot.slane %v1175_v7, %v1900_v20  ;;  %v1313_v20 = vrot.slane %v1176_v19, %v1890_v11 }
 0x1b2   :  { %v1213_v29 = vmax.f32 %v1212_v56, %v1200_v36 }
 0x1b4   :  { %v1214_v27 = vmax.f32 %v1213_v29, %v1203_v31 }
 0x1b6   :  { %v1215_v6 = vmax.f32 %v1214_v27, %v1206_v2 }
 0x1b8   :  { %v1216_v24 = vsub.f32 %v1179_v59, %v1215_v6  ;;  %v1226_v45 = vsub.f32 %v1182_v25, %v1215_v6  ;;  %v1236_v37 = vsub.f32 %v1185_v39, %v1215_v6  ;;  %v1246_v12 = vsub.f32 %v1188_v50, %v1215_v6 }
 0x1b9   :  { %v1256_v34 = vsub.f32 %v1191_v23, %v1215_v6  ;;  %v1266_v1 = vsub.f32 %v1194_v47, %v1215_v6  ;;  %v1276_v51 = vsub.f32 %v1197_v54, %v1215_v6  ;;  %v1286_v52 = vsub.f32 %v1200_v36, %v1215_v6 }
 0x1ba   :  { %v1217_v43 = vmul.f32 1.442695, %v1216_v24  ;;  %v1227_v63 = vmul.f32 1.442695, %v1226_v45  ;;  %v1237_v55 = vmul.f32 1.442695, %v1236_v37  ;;  %v1296_v58 = vsub.f32 %v1203_v31, %v1215_v6 }
 0x1bb   :  { %v1247_v8 = vmul.f32 1.442695, %v1246_v12  ;;  %v1257_v57 = vmul.f32 1.442695, %v1256_v34  ;;  %v1267_v48 = vmul.f32 1.442695, %v1266_v1  ;;  %v1306_v49 = vsub.f32 %v1206_v2, %v1215_v6 }
 0x1bc   :  { %1609 = vpow2.f32 %v1217_v43  ;;  %v1277_v35 = vmul.f32 1.442695, %v1276_v51  ;;  %v1287_v13 = vmul.f32 1.442695, %v1286_v52  ;;  %v1297_v59 = vmul.f32 1.442695, %v1296_v58 }
 0x1bd   :  { %1611 = vpow2.f32 %v1227_v63  ;;  %v1253_v39 = vrot.slane %v1175_v7, %v1894_v15  ;;  %v1307_v26 = vmul.f32 1.442695, %v1306_v49  ;;  %v1293_v2 = vrot.slane %v1175_v7, %v2651_v61 }
 0x1be   :  { %1613 = vpow2.f32 %v1237_v55  ;;  %v1303_v12 = vrot.slane %v1176_v19, %v1888_v10 }
 0x1bf   :  { %1615 = vpow2.f32 %v1247_v8 }
 0x1c0   :  { %1617 = vpow2.f32 %v1257_v57 }
 0x1c1   :  { %1619 = vpow2.f32 %v1267_v48 }
 0x1c2   :  { %1621 = vpow2.f32 %v1277_v35 }
 0x1c3   :  { %1623 = vpow2.f32 %v1287_v13 }
 0x1c4   :  { %1625 = vpow2.f32 %v1297_v59 }
 0x1c5   :  { %1627 = vpow2.f32 %v1307_v26 }
 0x1c6   :  { %v1610_v21 = vpop.eup %1609 }
 0x1c7   :  { %v1612_v60 = vpop.eup %1611  ;;  %v1224_v28 = vmul.f32 %v1610_v21, %v1223_v4 }
 0x1c8   :  { %v1614_v25 = vpop.eup %1613  ;;  %v1229_v38 = vadd.f32 %v1612_v60, %v1610_v21  ;;  %v1234_v42 = vmul.f32 %v1612_v60, %v1233_v44 }
 0x1c9   :  { %v1616_v0 = vpop.eup %1615  ;;  %v1244_v17 = vmul.f32 %v1614_v25, %v1243_v9 }
 0x1ca   :  { %v1235_v5 = vadd.f32 %v1234_v42, %v1224_v28  ;;  %v1239_v50 = vadd.f32 %v1614_v25, %v1229_v38  ;;  %v1618_v53 = vpop.eup %1617  ;;  %v1254_v3 = vmul.f32 %v1616_v0, %v1253_v39 }
 0x1cb   :  { %v1620_v16 = vpop.eup %1619  ;;  %v1264_v15 = vmul.f32 %v1618_v53, %v1263_v33 }
 0x1cc   :  { %v1245_v14 = vadd.f32 %v1244_v17, %v1235_v5  ;;  %v1249_v23 = vadd.f32 %v1616_v0, %v1239_v50  ;;  %v1622_v54 = vpop.eup %1621  ;;  %v1274_v32 = vmul.f32 %v1620_v16, %v1273_v41 }
 0x1cd   :  { %v1624_v18 = vpop.eup %1623  ;;  %v1284_v29 = vmul.f32 %v1622_v54, %v1283_v40 }
 0x1ce   :  { %v1255_v47 = vadd.f32 %v1254_v3, %v1245_v14  ;;  %v1259_v62 = vadd.f32 %v1618_v53, %v1249_v23  ;;  %v1626_v31 = vpop.eup %1625  ;;  %v1294_v37 = vmul.f32 %v1624_v18, %v1293_v2 }
 0x1cf   :  { %v1628_v6 = vpop.eup %1627  ;;  %v1304_v43 = vmul.f32 %v1626_v31, %v1303_v12 }
 0x1d0   :  { %v1265_v22 = vadd.f32 %v1264_v15, %v1255_v47  ;;  %v1269_v30 = vadd.f32 %v1620_v16, %v1259_v62  ;;  %v1314_v55 = vmul.f32 %v1628_v6, %v1313_v20 }
 0x1d2   :  { %v1279_v36 = vadd.f32 %v1622_v54, %v1269_v30  ;;  %v1275_v46 = vadd.f32 %v1274_v32, %v1265_v22 }
 0x1d4   :  { %v1289_v56 = vadd.f32 %v1624_v18, %v1279_v36  ;;  %v1285_v24 = vadd.f32 %v1284_v29, %v1275_v46 }
 0x1d6   :  { %v1299_v27 = vadd.f32 %v1626_v31, %v1289_v56  ;;  %v1295_v34 = vadd.f32 %v1294_v37, %v1285_v24 }
 0x1d8   :  { %v1309_v45 = vadd.f32 %v1628_v6, %v1299_v27  ;;  %v1305_v63 = vadd.f32 %v1304_v43, %v1295_v34 }
 0x1da   :  { %1629 = vrcp.f32 %v1309_v45  ;;  %v1315_v8 = vadd.f32 %v1314_v55, %v1305_v63 }
 0x1e4   :  { %v1630_v1 = vpop.eup %1629 }
 0x1e5   :  { %v1317_v57 = vmul.f32 %v1630_v1, %v1315_v8 }
 0x1e7   :  { %v1319_v61 = vsel %vm1318_vm8, %v1317_v57, 0.0 }
 0x1e8   :  { %1320 = vadd.xlane.f32.xlu1 %v1319_v61 }
 0x275   :  { %v1321_v51 = vpop.xlane.xlu1 %1320 }
 0x276   :  { %1323 = vst.msk [vmem:[%s2646_s9] sm:$0x3] %vm1322_vm9, %v1321_v51 }
 0x277   :  { %1328 = vsyncpa [#allocation4], 1 }
 0x278   :  { %1329 = vsyncpa [#allocation6], 1 }
 0x279   :  { %1330 = vsyncpa [#allocation9], 1 }

</bundles_post_ra>
